<compile_context>
chip_gen: v6e
topology: v6e:2x2x1
jax: 0.10.0
libtpu: 0.0.40
codegen_flags: <defaults>
</compile_context>

<pallas_src>
import functools

import jax
import jax.numpy as jnp
from jax import lax
from jax.experimental import pallas as pl
from jax.experimental.pallas import tpu as pltpu

# MXU-operand dtype. bf16 is native on all three MXU generations; f32 operands cost a
# multi-pass matmul and double weight VMEM/DMA bytes.  f32 accumulation / hidden state
# / tanh are kept regardless.  Use jnp.float32 for bit-tight correctness checks.
DEFAULT_MATMUL_DTYPE = jnp.bfloat16


def _round_up(x, m):
    return (x + m - 1) // m * m


@functools.lru_cache(maxsize=None)
def _vmem_capacity_bytes():
    try:
        return int(pltpu.get_tpu_info().vmem_capacity_bytes)
    except Exception:
        return 64 * 1024 * 1024  # conservative fallback (v7x per-TC capacity)


@functools.lru_cache(maxsize=None)
def _vmem_limit_bytes():
    # Generation-aware scoped VMEM: ~100 MiB on 128 MiB chips (v5e/v6e), ~51 MiB on v7x.
    return min(int(_vmem_capacity_bytes() * 0.8), 100 * 1024 * 1024)


@functools.lru_cache(maxsize=None)
def _tensorcores_per_chip():
    # Split the batch across TensorCores only where there is >1 TC per chip (v7x).
    # On single-TC chips (v5e/v6e) splitting only serializes the recurrence twice.
    # TODO(synk): also detect v4/v5p megacore (2 TCs) if those parts are targeted.
    try:
        kind = jax.devices()[0].device_kind.lower()
    except Exception:
        return 1
    return 2 if ("v7" in kind or "tpu7" in kind) else 1


def _pick_time_chunk(T, Bp, Hp, seq_itemsize):
    """Time-chunk length: as large as the VMEM budget allows (<=128), zero padding first."""
    # Per-timestep VMEM in the recurrence kernel: f32 u_scr + ~3x seq-dtype in/out slabs.
    per_t = Bp * Hp * (4 + 3 * seq_itemsize)
    tc_max = int(max(8, min(128, (_vmem_limit_bytes() // 4) // max(per_t, 1))))
    if T <= tc_max:
        return T
    for c in range(tc_max, 7, -1):        # prefer an exact divisor: no time padding
        if T % c == 0:
            return c
    # No divisor >= 8: minimize time padding (prefer larger chunks on ties).
    return min(range(8, tc_max + 1), key=lambda c: (-(-T // c) * c, -c))


# ----------------------------- Pallas kernels -------------------------------

def _rnn_fused_kernel(x_ref, wih_ref, whh_ref, bias_ref, y_ref, h_scr, u_scr, *, unroll):
    """One (batch block, time chunk) grid step of the fused projection + recurrence.

    x_ref   : (Tc, Bb, Din)  layer input chunk (f32 / bf16)
    wih_ref : (Din, Hp)      W_ih^T, zero padded, MXU dtype
    whh_ref : (Hp, Hp)       W_hh^T, zero padded, MXU dtype
    bias_ref: (1, Hp)        b_ih + b_hh, f32
    y_ref   : (Tc, Bb, Hp)   layer outputs for this chunk (seq dtype)
    h_scr   : (Bb, Hp)       hidden state carried across time chunks (f32 scratch)
    u_scr   : (Tc, Bb, Hp)   chunk input projection (f32 scratch)
    """
    t_chunk = pl.program_id(1)

    @pl.when(t_chunk == 0)
    def _():
        h_scr[...] = jnp.zeros_like(h_scr)

    wih = wih_ref[...]
    whh = whh_ref[...]  # resident weight, loaded once per grid step

    tc, bb, din = x_ref.shape
    hp = whh.shape[1]

    # Whole-chunk input projection: one MXU matmul, OFF the serial critical path.
    x2 = x_ref[...].reshape(tc * bb, din).astype(wih.dtype)
    u2 = jnp.dot(x2, wih, preferred_element_type=jnp.float32) + bias_ref[...]
    u_scr[...] = u2.reshape(tc, bb, hp)

    def step(i, h):
        pre = u_scr[i] + jnp.dot(h.astype(whh.dtype), whh,
                                 preferred_element_type=jnp.float32)
        h_new = jnp.tanh(pre)               # f32 tanh (EUP), f32 hidden state
        y_ref[i] = h_new.astype(y_ref.dtype)
        return h_new

    h_scr[...] = lax.fori_loop(0, tc, step, h_scr[...], unroll=unroll)


def _linear_kernel(x_ref, w_ref, b_ref, o_ref):
    """o = x @ W_t + b with W_t = W^T pre-transposed / padded / pre-cast."""
    w = w_ref[...]
    o_ref[...] = (jnp.dot(x_ref[...].astype(w.dtype), w,
                          preferred_element_type=jnp.float32)
                  + b_ref[...]).astype(o_ref.dtype)


# ------------------------------ wrappers -------------------------------------

def rnn_fused_layer(x_seq, wih_t, whh_t, bias, *, tc, bb, out_dtype):
    """Fused input-projection + tanh recurrence for one RNN layer.

    x_seq: (Tp, Bp, Din) time-major padded input -> (Tp, Bp, Hp) in out_dtype.
    """
    Tp, Bp, Din = x_seq.shape
    Hp = whh_t.shape[1]
    n_bb = Bp // bb
    n_tc = Tp // tc
    unroll = max(1, min(8, tc))  # partial unroll: amortize loop overhead, bound vregs

    # Single-buffer a large constant-index W_hh (halves its VMEM residency on v7x's
    # 64 MiB with zero perf cost: its index_map never changes).
    whh_kwargs = {}
    if whh_t.size * whh_t.dtype.itemsize > (4 << 20):
        whh_kwargs = dict(pipeline_mode=pl.Buffered(1))

    return pl.pallas_call(
        functools.partial(_rnn_fused_kernel, unroll=unroll),
        out_shape=jax.ShapeDtypeStruct((Tp, Bp, Hp), out_dtype),
        grid_spec=pltpu.PrefetchScalarGridSpec(
            num_scalar_prefetch=0,
            grid=(n_bb, n_tc),
            in_specs=[
                pl.BlockSpec((tc, bb, Din), lambda b, t: (t, b, 0)),
                pl.BlockSpec((Din, Hp), lambda b, t: (0, 0)),
                pl.BlockSpec((Hp, Hp), lambda b, t: (0, 0), **whh_kwargs),
                pl.BlockSpec((1, Hp), lambda b, t: (0, 0)),
            ],
            out_specs=pl.BlockSpec((tc, bb, Hp), lambda b, t: (t, b, 0)),
            scratch_shapes=[
                pltpu.VMEM((bb, Hp), jnp.float32),      # carried hidden state
                pltpu.VMEM((tc, bb, Hp), jnp.float32),  # chunk input projection
            ],
        ),
        compiler_params=pltpu.CompilerParams(
            dimension_semantics=("parallel", "arbitrary"),  # time is sequential
            vmem_limit_bytes=_vmem_limit_bytes(),
        ),
    )(x_seq, wih_t, whh_t, bias)


def linear_tiled(x, w_t, b):
    """x: (N, Din) @ w_t: (Din, Dout) + b: (1, Dout) -> (N, Dout) float32.

    Tiled over rows and (if large) over Dout so output stores are lane-dense and the
    double-buffered tiles stay inside the generation's VMEM budget.
    """
    N, Din = x.shape
    Dout = w_t.shape[1]

    tn_max = 1024 if _vmem_capacity_bytes() >= (96 << 20) else 512
    N8 = _round_up(N, 8)
    tn = min(tn_max, N8)
    Np = _round_up(N8, tn)
    if Np != N:
        x = jnp.pad(x, ((0, Np - N), (0, 0)))

    tj = min(1024, Dout)            # Dout is a multiple of 128 by construction
    while Dout % tj:
        tj -= 128

    out = pl.pallas_call(
        _linear_kernel,
        out_shape=jax.ShapeDtypeStruct((Np, Dout), jnp.float32),
        grid_spec=pltpu.PrefetchScalarGridSpec(
            num_scalar_prefetch=0,
            grid=(Np // tn, Dout // tj),
            in_specs=[
                pl.BlockSpec((tn, Din), lambda i, j: (i, 0)),
                pl.BlockSpec((Din, tj), lambda i, j: (0, j)),
                pl.BlockSpec((1, tj), lambda i, j: (0, j)),
            ],
            out_specs=pl.BlockSpec((tn, tj), lambda i, j: (i, j)),
        ),
        compiler_params=pltpu.CompilerParams(
            dimension_semantics=("parallel", "parallel"),
            vmem_limit_bytes=_vmem_limit_bytes(),
        ),
    )(x, w_t, b)
    return out[:N]


# ------------------------------ parameters -----------------------------------

def init_params(key, n_input, n_hidden, n_output, layers):
    """PyTorch-style init: U(-1/sqrt(H), 1/sqrt(H)) for RNN and Linear."""
    params = {"rnn": []}
    k = 1.0 / jnp.sqrt(jnp.float32(n_hidden))
    for l in range(layers):
        din = n_input if l == 0 else n_hidden
        key, k1, k2, k3, k4 = jax.random.split(key, 5)
        params["rnn"].append(dict(
            w_ih=jax.random.uniform(k1, (n_hidden, din), jnp.float32, -k, k),
            w_hh=jax.random.uniform(k2, (n_hidden, n_hidden), jnp.float32, -k, k),
            b_ih=jax.random.uniform(k3, (n_hidden,), jnp.float32, -k, k),
            b_hh=jax.random.uniform(k4, (n_hidden,), jnp.float32, -k, k),
        ))
    key, k1, k2 = jax.random.split(key, 3)
    params["linear"] = dict(
        w=jax.random.uniform(k1, (n_output, n_hidden), jnp.float32, -k, k),
        b=jax.random.uniform(k2, (n_output,), jnp.float32, -k, k),
    )
    return params


def prepare_weights(params, matmul_dtype=DEFAULT_MATMUL_DTYPE):
    """Pad / transpose / dtype-cast weights ONCE (not rebuilt per forward call)."""
    H = params["rnn"][0]["w_hh"].shape[0]
    Hp = _round_up(H, 128)
    layers = []
    for l, lp in enumerate(params["rnn"]):
        din = lp["w_ih"].shape[1]
        din_p = din if l == 0 else Hp          # layer-0 input keeps its native width
        wih_t = jnp.zeros((din_p, Hp), matmul_dtype).at[:din, :H].set(
            lp["w_ih"].T.astype(matmul_dtype))
        whh_t = jnp.zeros((Hp, Hp), matmul_dtype).at[:H, :H].set(
            lp["w_hh"].T.astype(matmul_dtype))
        bias = jnp.zeros((1, Hp), jnp.float32).at[0, :H].set(lp["b_ih"] + lp["b_hh"])
        layers.append(dict(wih_t=wih_t, whh_t=whh_t, bias=bias))
    wl, bl = params["linear"]["w"], params["linear"]["b"]
    n_output = wl.shape[0]
    Op = _round_up(n_output, 128)
    wl_t = jnp.zeros((Hp, Op), matmul_dtype).at[:H, :n_output].set(
        wl.T.astype(matmul_dtype))
    bl_p = jnp.zeros((1, Op), jnp.float32).at[0, :n_output].set(bl)
    return dict(layers=layers, wl_t=wl_t, bl_p=bl_p, b_out=bl)


# ------------------------------ forward --------------------------------------

@functools.partial(jax.jit, static_argnames=("return_sequence",))
def rnn_forward(prep, x, return_sequence=False):
    """x: (B, T, n_input) -> (B, n_output) or (B, T, n_output), float32."""
    B, T, _ = x.shape
    Hp = prep["layers"][0]["whh_t"].shape[0]
    n_output = prep["b_out"].shape[0]
    seq_dtype = prep["layers"][0]["whh_t"].dtype   # bf16 inter-layer storage in bf16 mode

    ncores = _tensorcores_per_chip()
    Bp = _round_up(B, 8 * ncores)   # sublane padding; x ncores so the TC split divides
    bb = Bp // ncores               # one batch block per TensorCore
    tc = _pick_time_chunk(T, Bp, Hp, jnp.dtype(seq_dtype).itemsize)
    Tp = _round_up(T, tc)

    # Time-major padded input (Tp, Bp, n_input).  Padded batch rows / trailing
    # timesteps evolve under the bias but are causally isolated and sliced off;
    # padded hidden COLUMNS stay exactly zero.
    h_seq = jnp.transpose(x, (1, 0, 2)).astype(jnp.float32)
    h_seq = jnp.pad(h_seq, ((0, Tp - T), (0, Bp - B), (0, 0)))

    for lp in prep["layers"]:
        h_seq = rnn_fused_layer(h_seq, lp["wih_t"], lp["whh_t"], lp["bias"],
                                tc=tc, bb=bb, out_dtype=seq_dtype)

    if return_sequence:
        y = linear_tiled(h_seq.reshape(Tp * Bp, Hp), prep["wl_t"], prep["bl_p"])
        y = y.reshape(Tp, Bp, -1)
        return jnp.transpose(y[:T, :B, :n_output], (1, 0, 2))   # (B, T, n_output)
    h_last = h_seq[T - 1]                                        # (Bp, Hp)
    return linear_tiled(h_last, prep["wl_t"], prep["bl_p"])[:B, :n_output]


def rnn_forward_ref(params, x, return_sequence=False):
    """Pure-JAX reference for correctness checking."""
    h_seq = jnp.transpose(x, (1, 0, 2)).astype(jnp.float32)
    for lp in params["rnn"]:
        B = h_seq.shape[1]
        H = lp["w_hh"].shape[0]

        def step(h, x_t, lp=lp):
            h_new = jnp.tanh(x_t @ lp["w_ih"].T + lp["b_ih"]
                             + h @ lp["w_hh"].T + lp["b_hh"])
            return h_new, h_new

        _, h_seq = jax.lax.scan(step, jnp.zeros((B, H), jnp.float32), h_seq)
    wl, bl = params["linear"]["w"], params["linear"]["b"]
    if return_sequence:
        return jnp.transpose(h_seq @ wl.T + bl, (1, 0, 2))
    return h_seq[-1] @ wl.T + bl


if __name__ == "__main__":
    B, T = 2, 8
    n_input, n_hidden, n_output, layers = 4, 32, 3, 2

    key = jax.random.PRNGKey(0)
    pkey, xkey = jax.random.split(key)
    params = init_params(pkey, n_input, n_hidden, n_output, layers)
    x = jax.random.normal(xkey, (B, T, n_input), jnp.float32)

    y_ref_last = rnn_forward_ref(params, x, return_sequence=False)
    y_ref_seq = rnn_forward_ref(params, x, return_sequence=True)

    # 1) float32 MXU operands: bit-tight check of the kernel structure.
    prep_f32 = prepare_weights(params, matmul_dtype=jnp.float32)
    y = jax.block_until_ready(rnn_forward(prep_f32, x, return_sequence=False))
    assert y.shape == (B, n_output)
    assert jnp.allclose(y, y_ref_last, atol=1e-5, rtol=1e-5)
    ys = jax.block_until_ready(rnn_forward(prep_f32, x, return_sequence=True))
    assert ys.shape == (B, T, n_output)
    assert jnp.allclose(ys, y_ref_seq, atol=1e-5, rtol=1e-5)

    # 2) default bfloat16 MXU operands (f32 accumulation / hidden state): loose check.
    prep_bf16 = prepare_weights(params, matmul_dtype=jnp.bfloat16)
    y = jax.block_until_ready(rnn_forward(prep_bf16, x, return_sequence=False))
    assert y.shape == (B, n_output)
    assert jnp.allclose(y, y_ref_last, atol=5e-2, rtol=5e-2)
    ys = jax.block_until_ready(rnn_forward(prep_bf16, x, return_sequence=True))
    assert ys.shape == (B, T, n_output)
    assert jnp.allclose(ys, y_ref_seq, atol=5e-2, rtol=5e-2)

    print("KERNEL_OK")
</pallas_src>

<mosaic_0001>
module attributes {stable_mosaic.version = 11 : i64} {
  func.func @_rnn_fused_kernel(%arg0: i32, %arg1: i32, %arg2: memref<8x8x128xf32, #tpu.memory_space<vmem>>, %arg3: memref<128x128xf32, #tpu.memory_space<vmem>>, %arg4: memref<128x128xf32, #tpu.memory_space<vmem>>, %arg5: memref<1x128xf32, #tpu.memory_space<vmem>>, %arg6: memref<8x8x128xf32, #tpu.memory_space<vmem>>, %arg7: memref<8x128xf32, #tpu.memory_space<vmem>>, %arg8: memref<8x8x128xf32, #tpu.memory_space<vmem>>) attributes {dimension_semantics = [#tpu.dimension_semantics<parallel>, #tpu.dimension_semantics<arbitrary>], iteration_bounds = array<i64: 1, 1>, scalar_prefetch = 0 : i64, scratch_operands = 2 : i64, tpu.core_type = #tpu.core_type<tc>, window_params = [{transform_indices = @transform_0, window_bounds = array<i64: 8, 8, 128>}, {pipeline_mode = #tpu.pipeline_mode<synchronous>, transform_indices = @transform_1, window_bounds = array<i64: 128, 128>}, {pipeline_mode = #tpu.pipeline_mode<synchronous>, transform_indices = @transform_2, window_bounds = array<i64: 128, 128>}, {pipeline_mode = #tpu.pipeline_mode<synchronous>, transform_indices = @transform_3, window_bounds = array<i64: 1, 128>}, {transform_indices = @transform_4, window_bounds = array<i64: 8, 8, 128>}]} {
    %c0_i32 = arith.constant 0 : i32
    %0 = arith.cmpi eq, %arg1, %c0_i32 : i32
    %1 = arith.extui %0 : i1 to i32
    %c0_i32_0 = arith.constant 0 : i32
    %2 = arith.cmpi ne, %1, %c0_i32_0 : i32
    scf.if %2 {
      %cst_57 = arith.constant 0.000000e+00 : f32
      %95 = vector.broadcast %cst_57 : f32 to vector<8x128xf32>
      %c0_58 = arith.constant 0 : index
      %c0_59 = arith.constant 0 : index
      %96 = vector.load %arg7[%c0_58, %c0_59] : memref<8x128xf32, #tpu.memory_space<vmem>>, vector<8x128xf32>
      tpu.vector_store %arg7[%c0_58, %c0_59], %95 {strides = array<i32>} : memref<8x128xf32, #tpu.memory_space<vmem>>, vector<8x128xf32>,
    } else {
    }
    %c0 = arith.constant 0 : index
    %c0_1 = arith.constant 0 : index
    %3 = vector.load %arg3[%c0, %c0_1] : memref<128x128xf32, #tpu.memory_space<vmem>>, vector<128x128xf32>
    %c0_2 = arith.constant 0 : index
    %c0_3 = arith.constant 0 : index
    %4 = vector.load %arg4[%c0_2, %c0_3] : memref<128x128xf32, #tpu.memory_space<vmem>>, vector<128x128xf32>
    %c0_4 = arith.constant 0 : index
    %c0_5 = arith.constant 0 : index
    %c0_6 = arith.constant 0 : index
    %5 = vector.load %arg2[%c0_4, %c0_5, %c0_6] : memref<8x8x128xf32, #tpu.memory_space<vmem>>, vector<8x8x128xf32>
    %6 = vector.shape_cast %5 : vector<8x8x128xf32> to vector<64x128xf32>
    %cst = arith.constant dense<0.000000e+00> : vector<64x128xf32>
    %7 = tpu.matmul %6, %3, %cst {dimension_numbers = #tpu.dot_dimension_numbers<[1], [0], [0], [1], [0, 0, 1, 1], [], []>} : vector<64x128xf32>, vector<128x128xf32>, vector<64x128xf32> -> vector<64x128xf32>
    %c0_7 = arith.constant 0 : index
    %c0_8 = arith.constant 0 : index
    %8 = vector.load %arg5[%c0_7, %c0_8] : memref<1x128xf32, #tpu.memory_space<vmem>>, vector<1x128xf32>
    %9 = vector.broadcast %8 : vector<1x128xf32> to vector<64x128xf32>
    %10 = arith.addf %7, %9 : vector<64x128xf32>
    %11 = vector.shape_cast %10 : vector<64x128xf32> to vector<8x8x128xf32>
    %c0_9 = arith.constant 0 : index
    %c0_10 = arith.constant 0 : index
    %c0_11 = arith.constant 0 : index
    %12 = vector.load %arg8[%c0_9, %c0_10, %c0_11] : memref<8x8x128xf32, #tpu.memory_space<vmem>>, vector<8x8x128xf32>
    tpu.vector_store %arg8[%c0_9, %c0_10, %c0_11], %11 {strides = array<i32>} : memref<8x8x128xf32, #tpu.memory_space<vmem>>, vector<8x8x128xf32>,
    %c0_12 = arith.constant 0 : index
    %c0_13 = arith.constant 0 : index
    %13 = vector.load %arg7[%c0_12, %c0_13] : memref<8x128xf32, #tpu.memory_space<vmem>>, vector<8x128xf32>
    %c0_i32_14 = arith.constant 0 : i32
    %14 = arith.index_cast %c0_i32_14 : i32 to index
    %c0_15 = arith.constant 0 : index
    %c0_16 = arith.constant 0 : index
    %15 = vector.load %arg8[%14, %c0_15, %c0_16] : memref<8x8x128xf32, #tpu.memory_space<vmem>>, vector<1x8x128xf32>
    %16 = vector.shape_cast %15 : vector<1x8x128xf32> to vector<8x128xf32>
    %cst_17 = arith.constant dense<0.000000e+00> : vector<8x128xf32>
    %17 = tpu.matmul %13, %4, %cst_17 {dimension_numbers = #tpu.dot_dimension_numbers<[1], [0], [0], [1], [0, 0, 1, 1], [], []>} : vector<8x128xf32>, vector<128x128xf32>, vector<8x128xf32> -> vector<8x128xf32>
    %18 = arith.addf %16, %17 : vector<8x128xf32>
    %19 = math.tanh %18 : vector<8x128xf32>
    %20 = arith.index_cast %c0_i32_14 : i32 to index
    %c0_18 = arith.constant 0 : index
    %c0_19 = arith.constant 0 : index
    %21 = vector.load %arg6[%20, %c0_18, %c0_19] : memref<8x8x128xf32, #tpu.memory_space<vmem>>, vector<1x8x128xf32>
    %22 = vector.shape_cast %21 : vector<1x8x128xf32> to vector<8x128xf32>
    %23 = vector.shape_cast %19 : vector<8x128xf32> to vector<1x8x128xf32>
    tpu.vector_store %arg6[%20, %c0_18, %c0_19], %23 {strides = array<i32>} : memref<8x8x128xf32, #tpu.memory_space<vmem>>, vector<1x8x128xf32>,
    %c1_i32 = arith.constant 1 : i32
    %24 = arith.index_cast %c1_i32 : i32 to index
    %c0_20 = arith.constant 0 : index
    %c0_21 = arith.constant 0 : index
    %25 = vector.load %arg8[%24, %c0_20, %c0_21] : memref<8x8x128xf32, #tpu.memory_space<vmem>>, vector<1x8x128xf32>
    %26 = vector.shape_cast %25 : vector<1x8x128xf32> to vector<8x128xf32>
    %cst_22 = arith.constant dense<0.000000e+00> : vector<8x128xf32>
    %27 = tpu.matmul %19, %4, %cst_22 {dimension_numbers = #tpu.dot_dimension_numbers<[1], [0], [0], [1], [0, 0, 1, 1], [], []>} : vector<8x128xf32>, vector<128x128xf32>, vector<8x128xf32> -> vector<8x128xf32>
    %28 = arith.addf %26, %27 : vector<8x128xf32>
    %29 = math.tanh %28 : vector<8x128xf32>
    %30 = arith.index_cast %c1_i32 : i32 to index
    %c0_23 = arith.constant 0 : index
    %c0_24 = arith.constant 0 : index
    %31 = vector.load %arg6[%30, %c0_23, %c0_24] : memref<8x8x128xf32, #tpu.memory_space<vmem>>, vector<1x8x128xf32>
    %32 = vector.shape_cast %31 : vector<1x8x128xf32> to vector<8x128xf32>
    %33 = vector.shape_cast %29 : vector<8x128xf32> to vector<1x8x128xf32>
    tpu.vector_store %arg6[%30, %c0_23, %c0_24], %33 {strides = array<i32>} : memref<8x8x128xf32, #tpu.memory_space<vmem>>, vector<1x8x128xf32>,
    %c2_i32 = arith.constant 2 : i32
    %34 = arith.index_cast %c2_i32 : i32 to index
    %c0_25 = arith.constant 0 : index
    %c0_26 = arith.constant 0 : index
    %35 = vector.load %arg8[%34, %c0_25, %c0_26] : memref<8x8x128xf32, #tpu.memory_space<vmem>>, vector<1x8x128xf32>
    %36 = vector.shape_cast %35 : vector<1x8x128xf32> to vector<8x128xf32>
    %cst_27 = arith.constant dense<0.000000e+00> : vector<8x128xf32>
    %37 = tpu.matmul %29, %4, %cst_27 {dimension_numbers = #tpu.dot_dimension_numbers<[1], [0], [0], [1], [0, 0, 1, 1], [], []>} : vector<8x128xf32>, vector<128x128xf32>, vector<8x128xf32> -> vector<8x128xf32>
    %38 = arith.addf %36, %37 : vector<8x128xf32>
    %39 = math.tanh %38 : vector<8x128xf32>
    %40 = arith.index_cast %c2_i32 : i32 to index
    %c0_28 = arith.constant 0 : index
    %c0_29 = arith.constant 0 : index
    %41 = vector.load %arg6[%40, %c0_28, %c0_29] : memref<8x8x128xf32, #tpu.memory_space<vmem>>, vector<1x8x128xf32>
    %42 = vector.shape_cast %41 : vector<1x8x128xf32> to vector<8x128xf32>
    %43 = vector.shape_cast %39 : vector<8x128xf32> to vector<1x8x128xf32>
    tpu.vector_store %arg6[%40, %c0_28, %c0_29], %43 {strides = array<i32>} : memref<8x8x128xf32, #tpu.memory_space<vmem>>, vector<1x8x128xf32>,
    %c3_i32 = arith.constant 3 : i32
    %44 = arith.index_cast %c3_i32 : i32 to index
    %c0_30 = arith.constant 0 : index
    %c0_31 = arith.constant 0 : index
    %45 = vector.load %arg8[%44, %c0_30, %c0_31] : memref<8x8x128xf32, #tpu.memory_space<vmem>>, vector<1x8x128xf32>
    %46 = vector.shape_cast %45 : vector<1x8x128xf32> to vector<8x128xf32>
    %cst_32 = arith.constant dense<0.000000e+00> : vector<8x128xf32>
    %47 = tpu.matmul %39, %4, %cst_32 {dimension_numbers = #tpu.dot_dimension_numbers<[1], [0], [0], [1], [0, 0, 1, 1], [], []>} : vector<8x128xf32>, vector<128x128xf32>, vector<8x128xf32> -> vector<8x128xf32>
    %48 = arith.addf %46, %47 : vector<8x128xf32>
    %49 = math.tanh %48 : vector<8x128xf32>
    %50 = arith.index_cast %c3_i32 : i32 to index
    %c0_33 = arith.constant 0 : index
    %c0_34 = arith.constant 0 : index
    %51 = vector.load %arg6[%50, %c0_33, %c0_34] : memref<8x8x128xf32, #tpu.memory_space<vmem>>, vector<1x8x128xf32>
    %52 = vector.shape_cast %51 : vector<1x8x128xf32> to vector<8x128xf32>
    %53 = vector.shape_cast %49 : vector<8x128xf32> to vector<1x8x128xf32>
    tpu.vector_store %arg6[%50, %c0_33, %c0_34], %53 {strides = array<i32>} : memref<8x8x128xf32, #tpu.memory_space<vmem>>, vector<1x8x128xf32>,
    %c4_i32 = arith.constant 4 : i32
    %54 = arith.index_cast %c4_i32 : i32 to index
    %c0_35 = arith.constant 0 : index
    %c0_36 = arith.constant 0 : index
    %55 = vector.load %arg8[%54, %c0_35, %c0_36] : memref<8x8x128xf32, #tpu.memory_space<vmem>>, vector<1x8x128xf32>
    %56 = vector.shape_cast %55 : vector<1x8x128xf32> to vector<8x128xf32>
    %cst_37 = arith.constant dense<0.000000e+00> : vector<8x128xf32>
    %57 = tpu.matmul %49, %4, %cst_37 {dimension_numbers = #tpu.dot_dimension_numbers<[1], [0], [0], [1], [0, 0, 1, 1], [], []>} : vector<8x128xf32>, vector<128x128xf32>, vector<8x128xf32> -> vector<8x128xf32>
    %58 = arith.addf %56, %57 : vector<8x128xf32>
    %59 = math.tanh %58 : vector<8x128xf32>
    %60 = arith.index_cast %c4_i32 : i32 to index
    %c0_38 = arith.constant 0 : index
    %c0_39 = arith.constant 0 : index
    %61 = vector.load %arg6[%60, %c0_38, %c0_39] : memref<8x8x128xf32, #tpu.memory_space<vmem>>, vector<1x8x128xf32>
    %62 = vector.shape_cast %61 : vector<1x8x128xf32> to vector<8x128xf32>
    %63 = vector.shape_cast %59 : vector<8x128xf32> to vector<1x8x128xf32>
    tpu.vector_store %arg6[%60, %c0_38, %c0_39], %63 {strides = array<i32>} : memref<8x8x128xf32, #tpu.memory_space<vmem>>, vector<1x8x128xf32>,
    %c5_i32 = arith.constant 5 : i32
    %64 = arith.index_cast %c5_i32 : i32 to index
    %c0_40 = arith.constant 0 : index
    %c0_41 = arith.constant 0 : index
    %65 = vector.load %arg8[%64, %c0_40, %c0_41] : memref<8x8x128xf32, #tpu.memory_space<vmem>>, vector<1x8x128xf32>
    %66 = vector.shape_cast %65 : vector<1x8x128xf32> to vector<8x128xf32>
    %cst_42 = arith.constant dense<0.000000e+00> : vector<8x128xf32>
    %67 = tpu.matmul %59, %4, %cst_42 {dimension_numbers = #tpu.dot_dimension_numbers<[1], [0], [0], [1], [0, 0, 1, 1], [], []>} : vector<8x128xf32>, vector<128x128xf32>, vector<8x128xf32> -> vector<8x128xf32>
    %68 = arith.addf %66, %67 : vector<8x128xf32>
    %69 = math.tanh %68 : vector<8x128xf32>
    %70 = arith.index_cast %c5_i32 : i32 to index
    %c0_43 = arith.constant 0 : index
    %c0_44 = arith.constant 0 : index
    %71 = vector.load %arg6[%70, %c0_43, %c0_44] : memref<8x8x128xf32, #tpu.memory_space<vmem>>, vector<1x8x128xf32>
    %72 = vector.shape_cast %71 : vector<1x8x128xf32> to vector<8x128xf32>
    %73 = vector.shape_cast %69 : vector<8x128xf32> to vector<1x8x128xf32>
    tpu.vector_store %arg6[%70, %c0_43, %c0_44], %73 {strides = array<i32>} : memref<8x8x128xf32, #tpu.memory_space<vmem>>, vector<1x8x128xf32>,
    %c6_i32 = arith.constant 6 : i32
    %74 = arith.index_cast %c6_i32 : i32 to index
    %c0_45 = arith.constant 0 : index
    %c0_46 = arith.constant 0 : index
    %75 = vector.load %arg8[%74, %c0_45, %c0_46] : memref<8x8x128xf32, #tpu.memory_space<vmem>>, vector<1x8x128xf32>
    %76 = vector.shape_cast %75 : vector<1x8x128xf32> to vector<8x128xf32>
    %cst_47 = arith.constant dense<0.000000e+00> : vector<8x128xf32>
    %77 = tpu.matmul %69, %4, %cst_47 {dimension_numbers = #tpu.dot_dimension_numbers<[1], [0], [0], [1], [0, 0, 1, 1], [], []>} : vector<8x128xf32>, vector<128x128xf32>, vector<8x128xf32> -> vector<8x128xf32>
    %78 = arith.addf %76, %77 : vector<8x128xf32>
    %79 = math.tanh %78 : vector<8x128xf32>
    %80 = arith.index_cast %c6_i32 : i32 to index
    %c0_48 = arith.constant 0 : index
    %c0_49 = arith.constant 0 : index
    %81 = vector.load %arg6[%80, %c0_48, %c0_49] : memref<8x8x128xf32, #tpu.memory_space<vmem>>, vector<1x8x128xf32>
    %82 = vector.shape_cast %81 : vector<1x8x128xf32> to vector<8x128xf32>
    %83 = vector.shape_cast %79 : vector<8x128xf32> to vector<1x8x128xf32>
    tpu.vector_store %arg6[%80, %c0_48, %c0_49], %83 {strides = array<i32>} : memref<8x8x128xf32, #tpu.memory_space<vmem>>, vector<1x8x128xf32>,
    %c7_i32 = arith.constant 7 : i32
    %84 = arith.index_cast %c7_i32 : i32 to index
    %c0_50 = arith.constant 0 : index
    %c0_51 = arith.constant 0 : index
    %85 = vector.load %arg8[%84, %c0_50, %c0_51] : memref<8x8x128xf32, #tpu.memory_space<vmem>>, vector<1x8x128xf32>
    %86 = vector.shape_cast %85 : vector<1x8x128xf32> to vector<8x128xf32>
    %cst_52 = arith.constant dense<0.000000e+00> : vector<8x128xf32>
    %87 = tpu.matmul %79, %4, %cst_52 {dimension_numbers = #tpu.dot_dimension_numbers<[1], [0], [0], [1], [0, 0, 1, 1], [], []>} : vector<8x128xf32>, vector<128x128xf32>, vector<8x128xf32> -> vector<8x128xf32>
    %88 = arith.addf %86, %87 : vector<8x128xf32>
    %89 = math.tanh %88 : vector<8x128xf32>
    %90 = arith.index_cast %c7_i32 : i32 to index
    %c0_53 = arith.constant 0 : index
    %c0_54 = arith.constant 0 : index
    %91 = vector.load %arg6[%90, %c0_53, %c0_54] : memref<8x8x128xf32, #tpu.memory_space<vmem>>, vector<1x8x128xf32>
    %92 = vector.shape_cast %91 : vector<1x8x128xf32> to vector<8x128xf32>
    %93 = vector.shape_cast %89 : vector<8x128xf32> to vector<1x8x128xf32>
    tpu.vector_store %arg6[%90, %c0_53, %c0_54], %93 {strides = array<i32>} : memref<8x8x128xf32, #tpu.memory_space<vmem>>, vector<1x8x128xf32>,
    %c8_i32 = arith.constant 8 : i32
    %c0_55 = arith.constant 0 : index
    %c0_56 = arith.constant 0 : index
    %94 = vector.load %arg7[%c0_55, %c0_56] : memref<8x128xf32, #tpu.memory_space<vmem>>, vector<8x128xf32>
    tpu.vector_store %arg7[%c0_55, %c0_56], %89 {strides = array<i32>} : memref<8x128xf32, #tpu.memory_space<vmem>>, vector<8x128xf32>,
    return
  }
  func.func @transform_0(%arg0: i32, %arg1: i32) -> (i32, i32, i32) {
    %c0_i32 = arith.constant 0 : i32
    %c0_i32_0 = arith.constant 0 : i32
    return %arg1, %arg0, %c0_i32 : i32, i32, i32
  }
  func.func @transform_1(%arg0: i32, %arg1: i32) -> (i32, i32) {
    %c0_i32 = arith.constant 0 : i32
    %c0_i32_0 = arith.constant 0 : i32
    %c0_i32_1 = arith.constant 0 : i32
    return %c0_i32, %c0_i32_0 : i32, i32
  }
  func.func @transform_2(%arg0: i32, %arg1: i32) -> (i32, i32) {
    %c0_i32 = arith.constant 0 : i32
    %c0_i32_0 = arith.constant 0 : i32
    %c0_i32_1 = arith.constant 0 : i32
    return %c0_i32, %c0_i32_0 : i32, i32
  }
  func.func @transform_3(%arg0: i32, %arg1: i32) -> (i32, i32) {
    %c0_i32 = arith.constant 0 : i32
    %c0_i32_0 = arith.constant 0 : i32
    %c0_i32_1 = arith.constant 0 : i32
    return %c0_i32, %c0_i32_0 : i32, i32
  }
  func.func @transform_4(%arg0: i32, %arg1: i32) -> (i32, i32, i32) {
    %c0_i32 = arith.constant 0 : i32
    %c0_i32_0 = arith.constant 0 : i32
    return %arg1, %arg0, %c0_i32 : i32, i32, i32
  }
}

module attributes {stable_mosaic.version = 11 : i64} {
  func.func @_rnn_fused_kernel(%arg0: i32, %arg1: i32, %arg2: memref<8x8x4xf32, #tpu.memory_space<vmem>>, %arg3: memref<4x128xf32, #tpu.memory_space<vmem>>, %arg4: memref<128x128xf32, #tpu.memory_space<vmem>>, %arg5: memref<1x128xf32, #tpu.memory_space<vmem>>, %arg6: memref<8x8x128xf32, #tpu.memory_space<vmem>>, %arg7: memref<8x128xf32, #tpu.memory_space<vmem>>, %arg8: memref<8x8x128xf32, #tpu.memory_space<vmem>>) attributes {dimension_semantics = [#tpu.dimension_semantics<parallel>, #tpu.dimension_semantics<arbitrary>], iteration_bounds = array<i64: 1, 1>, scalar_prefetch = 0 : i64, scratch_operands = 2 : i64, tpu.core_type = #tpu.core_type<tc>, window_params = [{transform_indices = @transform_0, window_bounds = array<i64: 8, 8, 4>}, {pipeline_mode = #tpu.pipeline_mode<synchronous>, transform_indices = @transform_1, window_bounds = array<i64: 4, 128>}, {pipeline_mode = #tpu.pipeline_mode<synchronous>, transform_indices = @transform_2, window_bounds = array<i64: 128, 128>}, {pipeline_mode = #tpu.pipeline_mode<synchronous>, transform_indices = @transform_3, window_bounds = array<i64: 1, 128>}, {transform_indices = @transform_4, window_bounds = array<i64: 8, 8, 128>}]} {
    %c0_i32 = arith.constant 0 : i32
    %0 = arith.cmpi eq, %arg1, %c0_i32 : i32
    %1 = arith.extui %0 : i1 to i32
    %c0_i32_0 = arith.constant 0 : i32
    %2 = arith.cmpi ne, %1, %c0_i32_0 : i32
    scf.if %2 {
      %cst_57 = arith.constant 0.000000e+00 : f32
      %95 = vector.broadcast %cst_57 : f32 to vector<8x128xf32>
      %c0_58 = arith.constant 0 : index
      %c0_59 = arith.constant 0 : index
      %96 = vector.load %arg7[%c0_58, %c0_59] : memref<8x128xf32, #tpu.memory_space<vmem>>, vector<8x128xf32>
      tpu.vector_store %arg7[%c0_58, %c0_59], %95 {strides = array<i32>} : memref<8x128xf32, #tpu.memory_space<vmem>>, vector<8x128xf32>,
    } else {
    }
    %c0 = arith.constant 0 : index
    %c0_1 = arith.constant 0 : index
    %3 = vector.load %arg3[%c0, %c0_1] : memref<4x128xf32, #tpu.memory_space<vmem>>, vector<4x128xf32>
    %c0_2 = arith.constant 0 : index
    %c0_3 = arith.constant 0 : index
    %4 = vector.load %arg4[%c0_2, %c0_3] : memref<128x128xf32, #tpu.memory_space<vmem>>, vector<128x128xf32>
    %c0_4 = arith.constant 0 : index
    %c0_5 = arith.constant 0 : index
    %c0_6 = arith.constant 0 : index
    %5 = vector.load %arg2[%c0_4, %c0_5, %c0_6] : memref<8x8x4xf32, #tpu.memory_space<vmem>>, vector<8x8x4xf32>
    %6 = vector.shape_cast %5 : vector<8x8x4xf32> to vector<64x4xf32>
    %cst = arith.constant dense<0.000000e+00> : vector<64x128xf32>
    %7 = tpu.matmul %6, %3, %cst {dimension_numbers = #tpu.dot_dimension_numbers<[1], [0], [0], [1], [0, 0, 1, 1], [], []>} : vector<64x4xf32>, vector<4x128xf32>, vector<64x128xf32> -> vector<64x128xf32>
    %c0_7 = arith.constant 0 : index
    %c0_8 = arith.constant 0 : index
    %8 = vector.load %arg5[%c0_7, %c0_8] : memref<1x128xf32, #tpu.memory_space<vmem>>, vector<1x128xf32>
    %9 = vector.broadcast %8 : vector<1x128xf32> to vector<64x128xf32>
    %10 = arith.addf %7, %9 : vector<64x128xf32>
    %11 = vector.shape_cast %10 : vector<64x128xf32> to vector<8x8x128xf32>
    %c0_9 = arith.constant 0 : index
    %c0_10 = arith.constant 0 : index
    %c0_11 = arith.constant 0 : index
    %12 = vector.load %arg8[%c0_9, %c0_10, %c0_11] : memref<8x8x128xf32, #tpu.memory_space<vmem>>, vector<8x8x128xf32>
    tpu.vector_store %arg8[%c0_9, %c0_10, %c0_11], %11 {strides = array<i32>} : memref<8x8x128xf32, #tpu.memory_space<vmem>>, vector<8x8x128xf32>,
    %c0_12 = arith.constant 0 : index
    %c0_13 = arith.constant 0 : index
    %13 = vector.load %arg7[%c0_12, %c0_13] : memref<8x128xf32, #tpu.memory_space<vmem>>, vector<8x128xf32>
    %c0_i32_14 = arith.constant 0 : i32
    %14 = arith.index_cast %c0_i32_14 : i32 to index
    %c0_15 = arith.constant 0 : index
    %c0_16 = arith.constant 0 : index
    %15 = vector.load %arg8[%14, %c0_15, %c0_16] : memref<8x8x128xf32, #tpu.memory_space<vmem>>, vector<1x8x128xf32>
    %16 = vector.shape_cast %15 : vector<1x8x128xf32> to vector<8x128xf32>
    %cst_17 = arith.constant dense<0.000000e+00> : vector<8x128xf32>
    %17 = tpu.matmul %13, %4, %cst_17 {dimension_numbers = #tpu.dot_dimension_numbers<[1], [0], [0], [1], [0, 0, 1, 1], [], []>} : vector<8x128xf32>, vector<128x128xf32>, vector<8x128xf32> -> vector<8x128xf32>
    %18 = arith.addf %16, %17 : vector<8x128xf32>
    %19 = math.tanh %18 : vector<8x128xf32>
    %20 = arith.index_cast %c0_i32_14 : i32 to index
    %c0_18 = arith.constant 0 : index
    %c0_19 = arith.constant 0 : index
    %21 = vector.load %arg6[%20, %c0_18, %c0_19] : memref<8x8x128xf32, #tpu.memory_space<vmem>>, vector<1x8x128xf32>
    %22 = vector.shape_cast %21 : vector<1x8x128xf32> to vector<8x128xf32>
    %23 = vector.shape_cast %19 : vector<8x128xf32> to vector<1x8x128xf32>
    tpu.vector_store %arg6[%20, %c0_18, %c0_19], %23 {strides = array<i32>} : memref<8x8x128xf32, #tpu.memory_space<vmem>>, vector<1x8x128xf32>,
    %c1_i32 = arith.constant 1 : i32
    %24 = arith.index_cast %c1_i32 : i32 to index
    %c0_20 = arith.constant 0 : index
    %c0_21 = arith.constant 0 : index
    %25 = vector.load %arg8[%24, %c0_20, %c0_21] : memref<8x8x128xf32, #tpu.memory_space<vmem>>, vector<1x8x128xf32>
    %26 = vector.shape_cast %25 : vector<1x8x128xf32> to vector<8x128xf32>
    %cst_22 = arith.constant dense<0.000000e+00> : vector<8x128xf32>
    %27 = tpu.matmul %19, %4, %cst_22 {dimension_numbers = #tpu.dot_dimension_numbers<[1], [0], [0], [1], [0, 0, 1, 1], [], []>} : vector<8x128xf32>, vector<128x128xf32>, vector<8x128xf32> -> vector<8x128xf32>
    %28 = arith.addf %26, %27 : vector<8x128xf32>
    %29 = math.tanh %28 : vector<8x128xf32>
    %30 = arith.index_cast %c1_i32 : i32 to index
    %c0_23 = arith.constant 0 : index
    %c0_24 = arith.constant 0 : index
    %31 = vector.load %arg6[%30, %c0_23, %c0_24] : memref<8x8x128xf32, #tpu.memory_space<vmem>>, vector<1x8x128xf32>
    %32 = vector.shape_cast %31 : vector<1x8x128xf32> to vector<8x128xf32>
    %33 = vector.shape_cast %29 : vector<8x128xf32> to vector<1x8x128xf32>
    tpu.vector_store %arg6[%30, %c0_23, %c0_24], %33 {strides = array<i32>} : memref<8x8x128xf32, #tpu.memory_space<vmem>>, vector<1x8x128xf32>,
    %c2_i32 = arith.constant 2 : i32
    %34 = arith.index_cast %c2_i32 : i32 to index
    %c0_25 = arith.constant 0 : index
    %c0_26 = arith.constant 0 : index
    %35 = vector.load %arg8[%34, %c0_25, %c0_26] : memref<8x8x128xf32, #tpu.memory_space<vmem>>, vector<1x8x128xf32>
    %36 = vector.shape_cast %35 : vector<1x8x128xf32> to vector<8x128xf32>
    %cst_27 = arith.constant dense<0.000000e+00> : vector<8x128xf32>
    %37 = tpu.matmul %29, %4, %cst_27 {dimension_numbers = #tpu.dot_dimension_numbers<[1], [0], [0], [1], [0, 0, 1, 1], [], []>} : vector<8x128xf32>, vector<128x128xf32>, vector<8x128xf32> -> vector<8x128xf32>
    %38 = arith.addf %36, %37 : vector<8x128xf32>
    %39 = math.tanh %38 : vector<8x128xf32>
    %40 = arith.index_cast %c2_i32 : i32 to index
    %c0_28 = arith.constant 0 : index
    %c0_29 = arith.constant 0 : index
    %41 = vector.load %arg6[%40, %c0_28, %c0_29] : memref<8x8x128xf32, #tpu.memory_space<vmem>>, vector<1x8x128xf32>
    %42 = vector.shape_cast %41 : vector<1x8x128xf32> to vector<8x128xf32>
    %43 = vector.shape_cast %39 : vector<8x128xf32> to vector<1x8x128xf32>
    tpu.vector_store %arg6[%40, %c0_28, %c0_29], %43 {strides = array<i32>} : memref<8x8x128xf32, #tpu.memory_space<vmem>>, vector<1x8x128xf32>,
    %c3_i32 = arith.constant 3 : i32
    %44 = arith.index_cast %c3_i32 : i32 to index
    %c0_30 = arith.constant 0 : index
    %c0_31 = arith.constant 0 : index
    %45 = vector.load %arg8[%44, %c0_30, %c0_31] : memref<8x8x128xf32, #tpu.memory_space<vmem>>, vector<1x8x128xf32>
    %46 = vector.shape_cast %45 : vector<1x8x128xf32> to vector<8x128xf32>
    %cst_32 = arith.constant dense<0.000000e+00> : vector<8x128xf32>
    %47 = tpu.matmul %39, %4, %cst_32 {dimension_numbers = #tpu.dot_dimension_numbers<[1], [0], [0], [1], [0, 0, 1, 1], [], []>} : vector<8x128xf32>, vector<128x128xf32>, vector<8x128xf32> -> vector<8x128xf32>
    %48 = arith.addf %46, %47 : vector<8x128xf32>
    %49 = math.tanh %48 : vector<8x128xf32>
    %50 = arith.index_cast %c3_i32 : i32 to index
    %c0_33 = arith.constant 0 : index
    %c0_34 = arith.constant 0 : index
    %51 = vector.load %arg6[%50, %c0_33, %c0_34] : memref<8x8x128xf32, #tpu.memory_space<vmem>>, vector<1x8x128xf32>
    %52 = vector.shape_cast %51 : vector<1x8x128xf32> to vector<8x128xf32>
    %53 = vector.shape_cast %49 : vector<8x128xf32> to vector<1x8x128xf32>
    tpu.vector_store %arg6[%50, %c0_33, %c0_34], %53 {strides = array<i32>} : memref<8x8x128xf32, #tpu.memory_space<vmem>>, vector<1x8x128xf32>,
    %c4_i32 = arith.constant 4 : i32
    %54 = arith.index_cast %c4_i32 : i32 to index
    %c0_35 = arith.constant 0 : index
    %c0_36 = arith.constant 0 : index
    %55 = vector.load %arg8[%54, %c0_35, %c0_36] : memref<8x8x128xf32, #tpu.memory_space<vmem>>, vector<1x8x128xf32>
    %56 = vector.shape_cast %55 : vector<1x8x128xf32> to vector<8x128xf32>
    %cst_37 = arith.constant dense<0.000000e+00> : vector<8x128xf32>
    %57 = tpu.matmul %49, %4, %cst_37 {dimension_numbers = #tpu.dot_dimension_numbers<[1], [0], [0], [1], [0, 0, 1, 1], [], []>} : vector<8x128xf32>, vector<128x128xf32>, vector<8x128xf32> -> vector<8x128xf32>
    %58 = arith.addf %56, %57 : vector<8x128xf32>
    %59 = math.tanh %58 : vector<8x128xf32>
    %60 = arith.index_cast %c4_i32 : i32 to index
    %c0_38 = arith.constant 0 : index
    %c0_39 = arith.constant 0 : index
    %61 = vector.load %arg6[%60, %c0_38, %c0_39] : memref<8x8x128xf32, #tpu.memory_space<vmem>>, vector<1x8x128xf32>
    %62 = vector.shape_cast %61 : vector<1x8x128xf32> to vector<8x128xf32>
    %63 = vector.shape_cast %59 : vector<8x128xf32> to vector<1x8x128xf32>
    tpu.vector_store %arg6[%60, %c0_38, %c0_39], %63 {strides = array<i32>} : memref<8x8x128xf32, #tpu.memory_space<vmem>>, vector<1x8x128xf32>,
    %c5_i32 = arith.constant 5 : i32
    %64 = arith.index_cast %c5_i32 : i32 to index
    %c0_40 = arith.constant 0 : index
    %c0_41 = arith.constant 0 : index
    %65 = vector.load %arg8[%64, %c0_40, %c0_41] : memref<8x8x128xf32, #tpu.memory_space<vmem>>, vector<1x8x128xf32>
    %66 = vector.shape_cast %65 : vector<1x8x128xf32> to vector<8x128xf32>
    %cst_42 = arith.constant dense<0.000000e+00> : vector<8x128xf32>
    %67 = tpu.matmul %59, %4, %cst_42 {dimension_numbers = #tpu.dot_dimension_numbers<[1], [0], [0], [1], [0, 0, 1, 1], [], []>} : vector<8x128xf32>, vector<128x128xf32>, vector<8x128xf32> -> vector<8x128xf32>
    %68 = arith.addf %66, %67 : vector<8x128xf32>
    %69 = math.tanh %68 : vector<8x128xf32>
    %70 = arith.index_cast %c5_i32 : i32 to index
    %c0_43 = arith.constant 0 : index
    %c0_44 = arith.constant 0 : index
    %71 = vector.load %arg6[%70, %c0_43, %c0_44] : memref<8x8x128xf32, #tpu.memory_space<vmem>>, vector<1x8x128xf32>
    %72 = vector.shape_cast %71 : vector<1x8x128xf32> to vector<8x128xf32>
    %73 = vector.shape_cast %69 : vector<8x128xf32> to vector<1x8x128xf32>
    tpu.vector_store %arg6[%70, %c0_43, %c0_44], %73 {strides = array<i32>} : memref<8x8x128xf32, #tpu.memory_space<vmem>>, vector<1x8x128xf32>,
    %c6_i32 = arith.constant 6 : i32
    %74 = arith.index_cast %c6_i32 : i32 to index
    %c0_45 = arith.constant 0 : index
    %c0_46 = arith.constant 0 : index
    %75 = vector.load %arg8[%74, %c0_45, %c0_46] : memref<8x8x128xf32, #tpu.memory_space<vmem>>, vector<1x8x128xf32>
    %76 = vector.shape_cast %75 : vector<1x8x128xf32> to vector<8x128xf32>
    %cst_47 = arith.constant dense<0.000000e+00> : vector<8x128xf32>
    %77 = tpu.matmul %69, %4, %cst_47 {dimension_numbers = #tpu.dot_dimension_numbers<[1], [0], [0], [1], [0, 0, 1, 1], [], []>} : vector<8x128xf32>, vector<128x128xf32>, vector<8x128xf32> -> vector<8x128xf32>
    %78 = arith.addf %76, %77 : vector<8x128xf32>
    %79 = math.tanh %78 : vector<8x128xf32>
    %80 = arith.index_cast %c6_i32 : i32 to index
    %c0_48 = arith.constant 0 : index
    %c0_49 = arith.constant 0 : index
    %81 = vector.load %arg6[%80, %c0_48, %c0_49] : memref<8x8x128xf32, #tpu.memory_space<vmem>>, vector<1x8x128xf32>
    %82 = vector.shape_cast %81 : vector<1x8x128xf32> to vector<8x128xf32>
    %83 = vector.shape_cast %79 : vector<8x128xf32> to vector<1x8x128xf32>
    tpu.vector_store %arg6[%80, %c0_48, %c0_49], %83 {strides = array<i32>} : memref<8x8x128xf32, #tpu.memory_space<vmem>>, vector<1x8x128xf32>,
    %c7_i32 = arith.constant 7 : i32
    %84 = arith.index_cast %c7_i32 : i32 to index
    %c0_50 = arith.constant 0 : index
    %c0_51 = arith.constant 0 : index
    %85 = vector.load %arg8[%84, %c0_50, %c0_51] : memref<8x8x128xf32, #tpu.memory_space<vmem>>, vector<1x8x128xf32>
    %86 = vector.shape_cast %85 : vector<1x8x128xf32> to vector<8x128xf32>
    %cst_52 = arith.constant dense<0.000000e+00> : vector<8x128xf32>
    %87 = tpu.matmul %79, %4, %cst_52 {dimension_numbers = #tpu.dot_dimension_numbers<[1], [0], [0], [1], [0, 0, 1, 1], [], []>} : vector<8x128xf32>, vector<128x128xf32>, vector<8x128xf32> -> vector<8x128xf32>
    %88 = arith.addf %86, %87 : vector<8x128xf32>
    %89 = math.tanh %88 : vector<8x128xf32>
    %90 = arith.index_cast %c7_i32 : i32 to index
    %c0_53 = arith.constant 0 : index
    %c0_54 = arith.constant 0 : index
    %91 = vector.load %arg6[%90, %c0_53, %c0_54] : memref<8x8x128xf32, #tpu.memory_space<vmem>>, vector<1x8x128xf32>
    %92 = vector.shape_cast %91 : vector<1x8x128xf32> to vector<8x128xf32>
    %93 = vector.shape_cast %89 : vector<8x128xf32> to vector<1x8x128xf32>
    tpu.vector_store %arg6[%90, %c0_53, %c0_54], %93 {strides = array<i32>} : memref<8x8x128xf32, #tpu.memory_space<vmem>>, vector<1x8x128xf32>,
    %c8_i32 = arith.constant 8 : i32
    %c0_55 = arith.constant 0 : index
    %c0_56 = arith.constant 0 : index
    %94 = vector.load %arg7[%c0_55, %c0_56] : memref<8x128xf32, #tpu.memory_space<vmem>>, vector<8x128xf32>
    tpu.vector_store %arg7[%c0_55, %c0_56], %89 {strides = array<i32>} : memref<8x128xf32, #tpu.memory_space<vmem>>, vector<8x128xf32>,
    return
  }
  func.func @transform_0(%arg0: i32, %arg1: i32) -> (i32, i32, i32) {
    %c0_i32 = arith.constant 0 : i32
    %c0_i32_0 = arith.constant 0 : i32
    return %arg1, %arg0, %c0_i32 : i32, i32, i32
  }
  func.func @transform_1(%arg0: i32, %arg1: i32) -> (i32, i32) {
    %c0_i32 = arith.constant 0 : i32
    %c0_i32_0 = arith.constant 0 : i32
    %c0_i32_1 = arith.constant 0 : i32
    return %c0_i32, %c0_i32_0 : i32, i32
  }
  func.func @transform_2(%arg0: i32, %arg1: i32) -> (i32, i32) {
    %c0_i32 = arith.constant 0 : i32
    %c0_i32_0 = arith.constant 0 : i32
    %c0_i32_1 = arith.constant 0 : i32
    return %c0_i32, %c0_i32_0 : i32, i32
  }
  func.func @transform_3(%arg0: i32, %arg1: i32) -> (i32, i32) {
    %c0_i32 = arith.constant 0 : i32
    %c0_i32_0 = arith.constant 0 : i32
    %c0_i32_1 = arith.constant 0 : i32
    return %c0_i32, %c0_i32_0 : i32, i32
  }
  func.func @transform_4(%arg0: i32, %arg1: i32) -> (i32, i32, i32) {
    %c0_i32 = arith.constant 0 : i32
    %c0_i32_0 = arith.constant 0 : i32
    return %arg1, %arg0, %c0_i32 : i32, i32, i32
  }
}

module attributes {stable_mosaic.version = 11 : i64} {
  func.func @_linear_kernel(%arg0: i32, %arg1: i32, %arg2: memref<8x128xf32, #tpu.memory_space<vmem>>, %arg3: memref<128x128xf32, #tpu.memory_space<vmem>>, %arg4: memref<1x128xf32, #tpu.memory_space<vmem>>, %arg5: memref<8x128xf32, #tpu.memory_space<vmem>>) attributes {dimension_semantics = [#tpu.dimension_semantics<parallel>, #tpu.dimension_semantics<parallel>], iteration_bounds = array<i64: 1, 1>, scalar_prefetch = 0 : i64, scratch_operands = 0 : i64, tpu.core_type = #tpu.core_type<tc>, window_params = [{transform_indices = @transform_0, window_bounds = array<i64: 8, 128>}, {transform_indices = @transform_1, window_bounds = array<i64: 128, 128>}, {transform_indices = @transform_2, window_bounds = array<i64: 1, 128>}, {transform_indices = @transform_3, window_bounds = array<i64: 8, 128>}]} {
    %c0 = arith.constant 0 : index
    %c0_0 = arith.constant 0 : index
    %0 = vector.load %arg3[%c0, %c0_0] : memref<128x128xf32, #tpu.memory_space<vmem>>, vector<128x128xf32>
    %c0_1 = arith.constant 0 : index
    %c0_2 = arith.constant 0 : index
    %1 = vector.load %arg2[%c0_1, %c0_2] : memref<8x128xf32, #tpu.memory_space<vmem>>, vector<8x128xf32>
    %cst = arith.constant dense<0.000000e+00> : vector<8x128xf32>
    %2 = tpu.matmul %1, %0, %cst {dimension_numbers = #tpu.dot_dimension_numbers<[1], [0], [0], [1], [0, 0, 1, 1], [], []>} : vector<8x128xf32>, vector<128x128xf32>, vector<8x128xf32> -> vector<8x128xf32>
    %c0_3 = arith.constant 0 : index
    %c0_4 = arith.constant 0 : index
    %3 = vector.load %arg4[%c0_3, %c0_4] : memref<1x128xf32, #tpu.memory_space<vmem>>, vector<1x128xf32>
    %4 = vector.broadcast %3 : vector<1x128xf32> to vector<8x128xf32>
    %5 = arith.addf %2, %4 : vector<8x128xf32>
    %c0_5 = arith.constant 0 : index
    %c0_6 = arith.constant 0 : index
    %6 = vector.load %arg5[%c0_5, %c0_6] : memref<8x128xf32, #tpu.memory_space<vmem>>, vector<8x128xf32>
    tpu.vector_store %arg5[%c0_5, %c0_6], %5 {strides = array<i32>} : memref<8x128xf32, #tpu.memory_space<vmem>>, vector<8x128xf32>,
    return
  }
  func.func @transform_0(%arg0: i32, %arg1: i32) -> (i32, i32) {
    %c0_i32 = arith.constant 0 : i32
    %c0_i32_0 = arith.constant 0 : i32
    return %arg0, %c0_i32 : i32, i32
  }
  func.func @transform_1(%arg0: i32, %arg1: i32) -> (i32, i32) {
    %c0_i32 = arith.constant 0 : i32
    %c0_i32_0 = arith.constant 0 : i32
    return %c0_i32, %arg1 : i32, i32
  }
  func.func @transform_2(%arg0: i32, %arg1: i32) -> (i32, i32) {
    %c0_i32 = arith.constant 0 : i32
    %c0_i32_0 = arith.constant 0 : i32
    return %c0_i32, %arg1 : i32, i32
  }
  func.func @transform_3(%arg0: i32, %arg1: i32) -> (i32, i32) {
    %c0_i32 = arith.constant 0 : i32
    return %arg0, %arg1 : i32, i32
  }
}

</mosaic_0001>

<bundles_post_ra>
// kernel: rnn_forward.5
= control target key start
LH: loop header
LB: loop body
LE: loop exit
PB: predicated region body
PF: predicated region fallthrough
CT: control target
= control target key end

     0   :  { %v168_v0 = vmov 0.0   ;;  %vm169_vm0 = vmmov 0   ;;  %s247_s1 = inlined_call_operand.vmem [shape: f32[128,128], index: 1, kind: input, shape index: {}]   ;;  %s248_s0 = inlined_call_operand.vmem [shape: f32[8,128], index: 0, kind: input, shape index: {}]   ;;  %s249_s2 = inlined_call_operand.vmem [shape: f32[1,128], index: 2, kind: input, shape index: {}]   ;;  %s250_s3 = inlined_call_operand.vmem [shape: f32[8,128], index: 3, kind: output, shape index: {}]  }
   0x1   :  { %131 = vmatprep.subr.mxu0 %v168_v0  ;;  %v29_v1 = vld [vmem:[%s247_s1 + $0x78] sm:$0xff]  ;;  %v28_v2 = vld [vmem:[%s247_s1 + $0x70] sm:$0xff]  ;;  %163 = vmatprep.mubr.msk.f32.mxu0 %vm169_vm0, %v168_v0  ;;  %v27_v3 = vld [vmem:[%s247_s1 + $0x68] sm:$0xff] }
   0x2   :  { %132 = vmatpush3.msra.mxu0 %v29_v1  ;;  %v26_v4 = vld [vmem:[%s247_s1 + $0x60] sm:$0xff]  ;;  %v25_v5 = vld [vmem:[%s247_s1 + $0x58] sm:$0xff]  ;;  %v24_v6 = vld [vmem:[%s247_s1 + $0x50] sm:$0xff] }
   0x3   :  { %133 = vmatprep.subr.mxu0 %v168_v0  ;;  %v23_v7 = vld [vmem:[%s247_s1 + $0x48] sm:$0xff]  ;;  %v22_v8 = vld [vmem:[%s247_s1 + $0x40] sm:$0xff]  ;;  %v21_v9 = vld [vmem:[%s247_s1 + $0x38] sm:$0xff] }
   0x4   :  { %134 = vmatpush3.msra.mxu0 %v28_v2  ;;  %v20_v10 = vld [vmem:[%s247_s1 + $0x30] sm:$0xff]  ;;  %v19_v11 = vld [vmem:[%s247_s1 + $0x28] sm:$0xff]  ;;  %v18_v12 = vld [vmem:[%s247_s1 + $0x20] sm:$0xff] }
   0x5   :  { %135 = vmatprep.subr.mxu0 %v168_v0  ;;  %v17_v13 = vld [vmem:[%s247_s1 + $0x18] sm:$0xff]  ;;  %v16_v14 = vld [vmem:[%s247_s1 + $0x10] sm:$0xff]  ;;  %v15_v15 = vld [vmem:[%s247_s1 + $0x8] sm:$0xff] }
   0x6   :  { %136 = vmatpush3.msra.mxu0 %v27_v3  ;;  %v14_v16 = vld [vmem:[%s247_s1] sm:$0xff] }
   0x7   :  { %137 = vmatprep.subr.mxu0 %v168_v0  ;;  %v30_v17 = vld [vmem:[%s248_s0] sm:$0xff] }
   0x8   :  { %138 = vmatpush3.msra.mxu0 %v26_v4  ;;  %v113_v18 = vld [vmem:[%s249_s2] ss:$0 sm:$0xff] }
   0x9   :  { %139 = vmatprep.subr.mxu0 %v168_v0 }
   0xa   :  { %140 = vmatpush3.msra.mxu0 %v25_v5 }
   0xb   :  { %141 = vmatprep.subr.mxu0 %v168_v0 }
   0xc   :  { %142 = vmatpush3.msra.mxu0 %v24_v6 }
   0xd   :  { %143 = vmatprep.subr.mxu0 %v168_v0 }
   0xe   :  { %144 = vmatpush3.msra.mxu0 %v23_v7 }
   0xf   :  { %145 = vmatprep.subr.mxu0 %v168_v0 }
  0x10   :  { %146 = vmatpush3.msra.mxu0 %v22_v8 }
  0x11   :  { %147 = vmatprep.subr.mxu0 %v168_v0 }
  0x12   :  { %148 = vmatpush3.msra.mxu0 %v21_v9 }
  0x13   :  { %149 = vmatprep.subr.mxu0 %v168_v0 }
  0x14   :  { %150 = vmatpush3.msra.mxu0 %v20_v10 }
  0x15   :  { %151 = vmatprep.subr.mxu0 %v168_v0 }
  0x16   :  { %152 = vmatpush3.msra.mxu0 %v19_v11 }
  0x17   :  { %153 = vmatprep.subr.mxu0 %v168_v0 }
  0x18   :  { %154 = vmatpush3.msra.mxu0 %v18_v12 }
  0x19   :  { %155 = vmatprep.subr.mxu0 %v168_v0 }
  0x1a   :  { %156 = vmatpush3.msra.mxu0 %v17_v13 }
  0x1b   :  { %157 = vmatprep.subr.mxu0 %v168_v0 }
  0x1c   :  { %158 = vmatpush3.msra.mxu0 %v16_v14 }
  0x1d   :  { %159 = vmatprep.subr.mxu0 %v168_v0 }
  0x1e   :  { %160 = vmatpush3.msra.mxu0 %v15_v15 }
  0x1f   :  { %161 = vmatprep.subr.mxu0 %v168_v0 }
  0x20   :  { %162 = vmatpush3.msra.mxu0 %v14_v16 }
  0x21   :  { %164 = vmatmul.mubr.f32.vlgmr.msra.gmra.mxu0 %v30_v17 }
  0xe1   :  { %v104_v19 = vpop.f32.mrf.mxu0 }
  0xe2   :  { %v105_v20 = vadd.f32 %v113_v18, %v104_v19 }
  0xe3   :  { %v165_v21 = vpop.f32.mrf.mxu0 }
  0xe4   :  { %108 = vst [vmem:[%s250_s3] sm:$0xff] %v105_v20 }

// kernel: rnn_forward.4
= control target key start
LH: loop header
LB: loop body
LE: loop exit
PB: predicated region body
PF: predicated region fallthrough
CT: control target
= control target key end

     0   :  { %v1304_v2 = vmov 0.0   ;;  %vm1305_vm0 = vmmov 0   ;;  %s1808_s1 = inlined_call_operand.vmem [shape: f32[128,128], index: 1, kind: input, shape index: {}]   ;;  %s1809_s2 = inlined_call_operand.vmem [shape: f32[128,128], index: 2, kind: input, shape index: {}]   ;;  %s1810_s0 = inlined_call_operand.vmem [shape: f32[8,8,128], index: 0, kind: input, shape index: {}]   ;;  %s1811_s3 = inlined_call_operand.vmem [shape: f32[1,128], index: 3, kind: input, shape index: {}]   ;;  %s1812_s4 = inlined_call_operand.vmem [shape: f32[8,8,128], index: 4, kind: output, shape index: {}]  }
   0x1   :  { %v37_v0 = vld [vmem:[%s1808_s1 + $0x78] sm:$0xff]  ;;  %v36_v1 = vld [vmem:[%s1808_s1 + $0x70] sm:$0xff]  ;;  %1006 = vmatprep.subr.mxu1 %v1304_v2  ;;  %1038 = vmatprep.mubr.msk.f32.mxu1 %vm1305_vm0, %v1304_v2  ;;  %v35_v5 = vld [vmem:[%s1808_s1 + $0x68] sm:$0xff] }
   0x2   :  { %v1341_v3 = vld [vmem:[%s1809_s2 + $0x78] sm:$0xff]  ;;  %962 = vmatprep.subr.mxu0 %v37_v0  ;;  %v1349_v4 = vld [vmem:[%s1809_s2 + $0x70] sm:$0xff]  ;;  %v1358_v6 = vld [vmem:[%s1809_s2 + $0x68] sm:$0xff] }
   0x3   :  { %1007 = vmatpush3.msra.mxu1 %v1341_v3  ;;  %963 = vmatpush3.msra.mxu0 %v37_v0  ;;  %v34_v7 = vld [vmem:[%s1808_s1 + $0x60] sm:$0xff]  ;;  %v33_v9 = vld [vmem:[%s1808_s1 + $0x58] sm:$0xff]  ;;  %v32_v11 = vld [vmem:[%s1808_s1 + $0x50] sm:$0xff] }
   0x4   :  { %1008 = vmatprep.subr.mxu1 %v1304_v2  ;;  %964 = vmatprep.subr.mxu0 %v36_v1  ;;  %v1368_v8 = vld [vmem:[%s1809_s2 + $0x60] sm:$0xff]  ;;  %v1378_v10 = vld [vmem:[%s1809_s2 + $0x58] sm:$0xff]  ;;  %v1388_v12 = vld [vmem:[%s1809_s2 + $0x50] sm:$0xff] }
   0x5   :  { %1009 = vmatpush3.msra.mxu1 %v1349_v4  ;;  %965 = vmatpush3.msra.mxu0 %v36_v1  ;;  %v31_v13 = vld [vmem:[%s1808_s1 + $0x48] sm:$0xff]  ;;  %v30_v15 = vld [vmem:[%s1808_s1 + $0x40] sm:$0xff]  ;;  %v29_v17 = vld [vmem:[%s1808_s1 + $0x38] sm:$0xff] }
   0x6   :  { %1010 = vmatprep.subr.mxu1 %v1304_v2  ;;  %966 = vmatprep.subr.mxu0 %v35_v5  ;;  %v1398_v14 = vld [vmem:[%s1809_s2 + $0x48] sm:$0xff]  ;;  %v1408_v16 = vld [vmem:[%s1809_s2 + $0x40] sm:$0xff]  ;;  %v1418_v18 = vld [vmem:[%s1809_s2 + $0x38] sm:$0xff] }
   0x7   :  { %1011 = vmatpush3.msra.mxu1 %v1358_v6  ;;  %967 = vmatpush3.msra.mxu0 %v35_v5  ;;  %v28_v19 = vld [vmem:[%s1808_s1 + $0x30] sm:$0xff]  ;;  %v27_v21 = vld [vmem:[%s1808_s1 + $0x28] sm:$0xff]  ;;  %v26_v23 = vld [vmem:[%s1808_s1 + $0x20] sm:$0xff] }
   0x8   :  { %1012 = vmatprep.subr.mxu1 %v1304_v2  ;;  %968 = vmatprep.subr.mxu0 %v34_v7  ;;  %v1428_v20 = vld [vmem:[%s1809_s2 + $0x30] sm:$0xff]  ;;  %v1438_v22 = vld [vmem:[%s1809_s2 + $0x28] sm:$0xff]  ;;  %v1448_v24 = vld [vmem:[%s1809_s2 + $0x20] sm:$0xff] }
   0x9   :  { %1013 = vmatpush3.msra.mxu1 %v1368_v8  ;;  %969 = vmatpush3.msra.mxu0 %v34_v7  ;;  %v25_v25 = vld [vmem:[%s1808_s1 + $0x18] sm:$0xff]  ;;  %v24_v27 = vld [vmem:[%s1808_s1 + $0x10] sm:$0xff]  ;;  %v23_v29 = vld [vmem:[%s1808_s1 + $0x8] sm:$0xff] }
   0xa   :  { %1014 = vmatprep.subr.mxu1 %v1304_v2  ;;  %970 = vmatprep.subr.mxu0 %v33_v9  ;;  %v1458_v26 = vld [vmem:[%s1809_s2 + $0x18] sm:$0xff]  ;;  %v1468_v28 = vld [vmem:[%s1809_s2 + $0x10] sm:$0xff]  ;;  %v54_v30 = vld [vmem:[%s1810_s0] sm:$0xff] }
   0xb   :  { %1015 = vmatpush3.msra.mxu1 %v1378_v10  ;;  %971 = vmatpush3.msra.mxu0 %v33_v9  ;;  %v1482_v31 = vld [vmem:[%s1809_s2 + $0x8] sm:$0xff]  ;;  %v22_v32 = vld [vmem:[%s1808_s1] sm:$0xff]  ;;  %v56_v35 = vld [vmem:[%s1810_s0 + $0x10] sm:$0xff] }
   0xc   :  { %1016 = vmatprep.subr.mxu1 %v1304_v2  ;;  %972 = vmatprep.subr.mxu0 %v32_v11  ;;  %v1491_v33 = vld [vmem:[%s1809_s2] sm:$0xff]  ;;  %v55_v34 = vld [vmem:[%s1810_s0 + $0x8] sm:$0xff]  ;;  %v57_v36 = vld [vmem:[%s1810_s0 + $0x18] sm:$0xff] }
   0xd   :  { %1017 = vmatpush3.msra.mxu1 %v1388_v12  ;;  %973 = vmatpush3.msra.mxu0 %v32_v11  ;;  %v58_v37 = vld [vmem:[%s1810_s0 + $0x20] sm:$0xff]  ;;  %v59_v38 = vld [vmem:[%s1810_s0 + $0x28] sm:$0xff]  ;;  %v60_v39 = vld [vmem:[%s1810_s0 + $0x30] sm:$0xff] }
   0xe   :  { %1018 = vmatprep.subr.mxu1 %v1304_v2  ;;  %974 = vmatprep.subr.mxu0 %v31_v13  ;;  %v61_v40 = vld [vmem:[%s1810_s0 + $0x38] sm:$0xff]  ;;  %v1591_v43 = vld [vmem:[%s1811_s3] ss:$0 sm:$0xff] }
   0xf   :  { %1019 = vmatpush3.msra.mxu1 %v1398_v14  ;;  %975 = vmatpush3.msra.mxu0 %v31_v13 }
  0x10   :  { %1020 = vmatprep.subr.mxu1 %v1304_v2  ;;  %976 = vmatprep.subr.mxu0 %v30_v15 }
  0x11   :  { %1021 = vmatpush3.msra.mxu1 %v1408_v16  ;;  %977 = vmatpush3.msra.mxu0 %v30_v15 }
  0x12   :  { %1022 = vmatprep.subr.mxu1 %v1304_v2  ;;  %978 = vmatprep.subr.mxu0 %v29_v17 }
  0x13   :  { %1023 = vmatpush3.msra.mxu1 %v1418_v18  ;;  %979 = vmatpush3.msra.mxu0 %v29_v17 }
  0x14   :  { %1024 = vmatprep.subr.mxu1 %v1304_v2  ;;  %980 = vmatprep.subr.mxu0 %v28_v19 }
  0x15   :  { %1025 = vmatpush3.msra.mxu1 %v1428_v20  ;;  %981 = vmatpush3.msra.mxu0 %v28_v19 }
  0x16   :  { %1026 = vmatprep.subr.mxu1 %v1304_v2  ;;  %982 = vmatprep.subr.mxu0 %v27_v21 }
  0x17   :  { %1027 = vmatpush3.msra.mxu1 %v1438_v22  ;;  %983 = vmatpush3.msra.mxu0 %v27_v21 }
  0x18   :  { %1028 = vmatprep.subr.mxu1 %v1304_v2  ;;  %984 = vmatprep.subr.mxu0 %v26_v23 }
  0x19   :  { %1029 = vmatpush3.msra.mxu1 %v1448_v24  ;;  %985 = vmatpush3.msra.mxu0 %v26_v23 }
  0x1a   :  { %1030 = vmatprep.subr.mxu1 %v1304_v2  ;;  %986 = vmatprep.subr.mxu0 %v25_v25 }
  0x1b   :  { %1031 = vmatpush3.msra.mxu1 %v1458_v26  ;;  %987 = vmatpush3.msra.mxu0 %v25_v25 }
  0x1c   :  { %1032 = vmatprep.subr.mxu1 %v1304_v2  ;;  %988 = vmatprep.subr.mxu0 %v24_v27 }
  0x1d   :  { %1033 = vmatpush3.msra.mxu1 %v1468_v28  ;;  %989 = vmatpush3.msra.mxu0 %v24_v27 }
  0x1e   :  { %1034 = vmatprep.subr.mxu1 %v1304_v2  ;;  %990 = vmatprep.subr.mxu0 %v23_v29 }
  0x1f   :  { %994 = vmatprep.mubr.f32.mxu0 %v54_v30  ;;  %991 = vmatpush3.msra.mxu0 %v23_v29 }
  0x20   :  { %1035 = vmatpush3.msra.mxu1 %v1482_v31  ;;  %992 = vmatprep.subr.mxu0 %v22_v32 }
  0x21   :  { %1036 = vmatprep.subr.mxu1 %v1304_v2  ;;  %993 = vmatpush3.msra.mxu0 %v22_v32 }
  0x22   :  { %1037 = vmatpush3.msra.mxu1 %v1491_v33  ;;  %995 = vmatmul.mubr.f32.vlgmr.msra.gmra.mxu0 %v55_v34 }
  0x23   :  { %1039 = vmatmul.mubr.f32.vlgmr.msra.gmra.mxu1 %v1304_v2  ;;  %1041 = vmatprep.subr.mxu0 %v1304_v2 }
  0x24   :  { %1076 = vmatprep.subr.mxu1 %v1304_v2  ;;  %1042 = vmatpush3.msra.mxu0 %v1341_v3 }
  0x25   :  { %1077 = vmatpush3.msra.mxu1 %v1341_v3  ;;  %1043 = vmatprep.subr.mxu0 %v1304_v2 }
  0x26   :  { %1078 = vmatprep.subr.mxu1 %v1304_v2  ;;  %1044 = vmatpush3.msra.mxu0 %v1349_v4 }
  0x27   :  { %1079 = vmatpush3.msra.mxu1 %v1349_v4  ;;  %1045 = vmatprep.subr.mxu0 %v1304_v2 }
  0x28   :  { %1080 = vmatprep.subr.mxu1 %v1304_v2  ;;  %1046 = vmatpush3.msra.mxu0 %v1358_v6 }
  0x29   :  { %1081 = vmatpush3.msra.mxu1 %v1358_v6  ;;  %1047 = vmatprep.subr.mxu0 %v1304_v2 }
  0x2a   :  { %1082 = vmatprep.subr.mxu1 %v1304_v2  ;;  %1048 = vmatpush3.msra.mxu0 %v1368_v8 }
  0x2b   :  { %1083 = vmatpush3.msra.mxu1 %v1368_v8  ;;  %1049 = vmatprep.subr.mxu0 %v1304_v2 }
  0x2c   :  { %1084 = vmatprep.subr.mxu1 %v1304_v2  ;;  %1050 = vmatpush3.msra.mxu0 %v1378_v10 }
  0x2d   :  { %1085 = vmatpush3.msra.mxu1 %v1378_v10  ;;  %1051 = vmatprep.subr.mxu0 %v1304_v2 }
  0x2e   :  { %1086 = vmatprep.subr.mxu1 %v1304_v2  ;;  %1052 = vmatpush3.msra.mxu0 %v1388_v12 }
  0x2f   :  { %1087 = vmatpush3.msra.mxu1 %v1388_v12  ;;  %1053 = vmatprep.subr.mxu0 %v1304_v2 }
  0x30   :  { %1088 = vmatprep.subr.mxu1 %v1304_v2  ;;  %1054 = vmatpush3.msra.mxu0 %v1398_v14 }
  0x31   :  { %1089 = vmatpush3.msra.mxu1 %v1398_v14  ;;  %1055 = vmatprep.subr.mxu0 %v1304_v2 }
  0x32   :  { %1090 = vmatprep.subr.mxu1 %v1304_v2  ;;  %1056 = vmatpush3.msra.mxu0 %v1408_v16 }
  0x33   :  { %1091 = vmatpush3.msra.mxu1 %v1408_v16  ;;  %1057 = vmatprep.subr.mxu0 %v1304_v2 }
  0x34   :  { %1092 = vmatprep.subr.mxu1 %v1304_v2  ;;  %1058 = vmatpush3.msra.mxu0 %v1418_v18 }
  0x35   :  { %1093 = vmatpush3.msra.mxu1 %v1418_v18  ;;  %1059 = vmatprep.subr.mxu0 %v1304_v2 }
  0x36   :  { %1094 = vmatprep.subr.mxu1 %v1304_v2  ;;  %1060 = vmatpush3.msra.mxu0 %v1428_v20 }
  0x37   :  { %1095 = vmatpush3.msra.mxu1 %v1428_v20  ;;  %1061 = vmatprep.subr.mxu0 %v1304_v2 }
  0x38   :  { %1096 = vmatprep.subr.mxu1 %v1304_v2  ;;  %1062 = vmatpush3.msra.mxu0 %v1438_v22 }
  0x39   :  { %1097 = vmatpush3.msra.mxu1 %v1438_v22  ;;  %1063 = vmatprep.subr.mxu0 %v1304_v2 }
  0x3a   :  { %1098 = vmatprep.subr.mxu1 %v1304_v2  ;;  %1064 = vmatpush3.msra.mxu0 %v1448_v24 }
  0x3b   :  { %1099 = vmatpush3.msra.mxu1 %v1448_v24  ;;  %1065 = vmatprep.subr.mxu0 %v1304_v2 }
  0x3c   :  { %1100 = vmatprep.subr.mxu1 %v1304_v2  ;;  %1066 = vmatpush3.msra.mxu0 %v1458_v26 }
  0x3d   :  { %1101 = vmatpush3.msra.mxu1 %v1458_v26  ;;  %1067 = vmatprep.subr.mxu0 %v1304_v2 }
  0x3e   :  { %1102 = vmatprep.subr.mxu1 %v1304_v2  ;;  %1068 = vmatpush3.msra.mxu0 %v1468_v28 }
  0x3f   :  { %1103 = vmatpush3.msra.mxu1 %v1468_v28  ;;  %1069 = vmatprep.subr.mxu0 %v1304_v2 }
  0x40   :  { %1104 = vmatprep.subr.mxu1 %v1304_v2  ;;  %1070 = vmatpush3.msra.mxu0 %v1482_v31 }
  0x41   :  { %1105 = vmatpush3.msra.mxu1 %v1482_v31  ;;  %1071 = vmatprep.subr.mxu0 %v1304_v2 }
  0x42   :  { %1106 = vmatprep.subr.mxu1 %v1304_v2  ;;  %1072 = vmatpush3.msra.mxu0 %v1491_v33 }
  0x43   :  { %1107 = vmatpush3.msra.mxu1 %v1491_v33  ;;  %1108 = vmatprep.mubr.msk.f32.mxu1 %vm1305_vm0, %v1304_v2 }
  0x44   :  { %1111 = vmatprep.subr.mxu0 %v1304_v2  ;;  %1146 = vmatprep.subr.mxu1 %v1304_v2 }
  0x45   :  { %997 = vmatprep.mubr.f32.mxu0 %v56_v35 }
  0x46   :  { %998 = vmatmul.mubr.f32.gmra.mxu0 %v57_v36 }
  0x47   :  { %1000 = vmatprep.mubr.f32.mxu0 %v58_v37 }
  0x4a   :  { %1001 = vmatmul.mubr.f32.gmra.mxu0 %v59_v38 }
  0x4b   :  { %1003 = vmatprep.mubr.f32.mxu0 %v60_v39 }
  0x4e   :  { %1004 = vmatmul.mubr.f32.gmra.mxu0 %v61_v40 }
  0x4f   :  { %1073 = vmatprep.mubr.msk.f32.mxu0 %vm1305_vm0, %v1304_v2 }
  0xe2   :  { %v996_v41 = vpop.f32.mrf.mxu0 }
  0xe3   :  { %v250_v42 = vpop.f32.mrf.mxu1  ;;  %v141_v55 = vadd.f32 %v996_v41, %v1591_v43 }
  0xe4   :  { %v135_v44 = vpop.f32.mrf.mxu0 }
  0xe5   :  { %v1040_v45 = vpop.f32.mrf.mxu1  ;;  %v136_v46 = vadd.f32 %v1591_v43, %v135_v44 }
  0xe7   :  { %v254_v47 = vadd.f32 %v250_v42, %v136_v46 }
  0xe9   :  { %1288 = vtanh.f32 %v254_v47 }
  0xf6   :  { %v1289_v48 = vpop.eup %1288 }
  0xf7   :  { %256 = vst [vmem:[%s1812_s4] sm:$0xff] %v1289_v48  ;;  %1074 = vmatmul.mubr.f32.vlgmr.msra.gmra.mxu0 %v1289_v48 }
  0xf8   :  { %1112 = vmatpush3.msra.mxu0 %v1341_v3  ;;  %1143 = vmatprep.mubr.msk.f32.mxu0 %vm1305_vm0, %v1304_v2 }
  0xf9   :  { %1113 = vmatprep.subr.mxu0 %v1304_v2 }
  0xfa   :  { %1114 = vmatpush3.msra.mxu0 %v1349_v4 }
  0xfb   :  { %1115 = vmatprep.subr.mxu0 %v1304_v2 }
  0xfc   :  { %1116 = vmatpush3.msra.mxu0 %v1358_v6 }
  0xfd   :  { %1117 = vmatprep.subr.mxu0 %v1304_v2 }
  0xfe   :  { %1118 = vmatpush3.msra.mxu0 %v1368_v8 }
  0xff   :  { %1119 = vmatprep.subr.mxu0 %v1304_v2 }
 0x100   :  { %1120 = vmatpush3.msra.mxu0 %v1378_v10 }
 0x101   :  { %1121 = vmatprep.subr.mxu0 %v1304_v2 }
 0x102   :  { %1122 = vmatpush3.msra.mxu0 %v1388_v12 }
 0x103   :  { %1123 = vmatprep.subr.mxu0 %v1304_v2 }
 0x104   :  { %1124 = vmatpush3.msra.mxu0 %v1398_v14 }
 0x105   :  { %1125 = vmatprep.subr.mxu0 %v1304_v2 }
 0x106   :  { %1126 = vmatpush3.msra.mxu0 %v1408_v16  ;;  %v1631_v49 = vpop.f32.mrf.mxu0 }
 0x107   :  { %1127 = vmatprep.subr.mxu0 %v1304_v2  ;;  %v151_v1 = vadd.f32 %v1631_v49, %v1591_v43 }
 0x108   :  { %1128 = vmatpush3.msra.mxu0 %v1418_v18  ;;  %v145_v50 = vpop.f32.mrf.mxu0 }
 0x109   :  { %1129 = vmatprep.subr.mxu0 %v1304_v2  ;;  %v146_v60 = vadd.f32 %v1591_v43, %v145_v50 }
 0x10a   :  { %1130 = vmatpush3.msra.mxu0 %v1428_v20  ;;  %v1633_v51 = vpop.f32.mrf.mxu0 }
 0x10b   :  { %1131 = vmatprep.subr.mxu0 %v1304_v2 }
 0x10c   :  { %1132 = vmatpush3.msra.mxu0 %v1438_v22  ;;  %v1635_v52 = vpop.f32.mrf.mxu0 }
 0x10d   :  { %1133 = vmatprep.subr.mxu0 %v1304_v2  ;;  %v156_v13 = vadd.f32 %v1591_v43, %v1635_v52 }
 0x10e   :  { %1134 = vmatpush3.msra.mxu0 %v1448_v24  ;;  %v1637_v53 = vpop.f32.mrf.mxu0 }
 0x10f   :  { %1135 = vmatprep.subr.mxu0 %v1304_v2 }
 0x110   :  { %1136 = vmatpush3.msra.mxu0 %v1458_v26  ;;  %v1639_v54 = vpop.f32.mrf.mxu0 }
 0x111   :  { %1137 = vmatprep.subr.mxu0 %v1304_v2 }
 0x112   :  { %1138 = vmatpush3.msra.mxu0 %v1468_v28 }
 0x113   :  { %1139 = vmatprep.subr.mxu0 %v1304_v2 }
 0x114   :  { %1140 = vmatpush3.msra.mxu0 %v1482_v31 }
 0x115   :  { %1141 = vmatprep.subr.mxu0 %v1304_v2 }
 0x116   :  { %1142 = vmatpush3.msra.mxu0 %v1491_v33 }
 0x117   :  { %1181 = vmatprep.subr.mxu0 %v1304_v2 }
 0x1b7   :  { %v325_v56 = vpop.f32.mrf.mxu0 }
 0x1b8   :  { %v329_v57 = vadd.f32 %v325_v56, %v141_v55 }
 0x1b9   :  { %v1075_v58 = vpop.f32.mrf.mxu0 }
 0x1ba   :  { %1290 = vtanh.f32 %v329_v57 }
 0x1c7   :  { %v1291_v59 = vpop.eup %1290 }
 0x1c8   :  { %795 = vst [vmem:[%s1812_s4 + $0x8] sm:$0xff] %v1291_v59  ;;  %1109 = vmatmul.mubr.f32.vlgmr.msra.gmra.mxu1 %v1291_v59 }
 0x1c9   :  { %1147 = vmatpush3.msra.mxu1 %v1341_v3  ;;  %1178 = vmatprep.mubr.msk.f32.mxu1 %vm1305_vm0, %v1304_v2 }
 0x1ca   :  { %1148 = vmatprep.subr.mxu1 %v1304_v2 }
 0x1cb   :  { %1149 = vmatpush3.msra.mxu1 %v1349_v4 }
 0x1cc   :  { %1150 = vmatprep.subr.mxu1 %v1304_v2 }
 0x1cd   :  { %1151 = vmatpush3.msra.mxu1 %v1358_v6 }
 0x1ce   :  { %1152 = vmatprep.subr.mxu1 %v1304_v2 }
 0x1cf   :  { %1153 = vmatpush3.msra.mxu1 %v1368_v8 }
 0x1d0   :  { %1154 = vmatprep.subr.mxu1 %v1304_v2 }
 0x1d1   :  { %1155 = vmatpush3.msra.mxu1 %v1378_v10 }
 0x1d2   :  { %1156 = vmatprep.subr.mxu1 %v1304_v2 }
 0x1d3   :  { %1157 = vmatpush3.msra.mxu1 %v1388_v12 }
 0x1d4   :  { %1158 = vmatprep.subr.mxu1 %v1304_v2 }
 0x1d5   :  { %1159 = vmatpush3.msra.mxu1 %v1398_v14 }
 0x1d6   :  { %1160 = vmatprep.subr.mxu1 %v1304_v2 }
 0x1d7   :  { %1161 = vmatpush3.msra.mxu1 %v1408_v16 }
 0x1d8   :  { %1162 = vmatprep.subr.mxu1 %v1304_v2 }
 0x1d9   :  { %1163 = vmatpush3.msra.mxu1 %v1418_v18 }
 0x1da   :  { %1164 = vmatprep.subr.mxu1 %v1304_v2 }
 0x1db   :  { %1165 = vmatpush3.msra.mxu1 %v1428_v20 }
 0x1dc   :  { %1166 = vmatprep.subr.mxu1 %v1304_v2 }
 0x1dd   :  { %1167 = vmatpush3.msra.mxu1 %v1438_v22 }
 0x1de   :  { %1168 = vmatprep.subr.mxu1 %v1304_v2 }
 0x1df   :  { %1169 = vmatpush3.msra.mxu1 %v1448_v24 }
 0x1e0   :  { %1170 = vmatprep.subr.mxu1 %v1304_v2 }
 0x1e1   :  { %1171 = vmatpush3.msra.mxu1 %v1458_v26 }
 0x1e2   :  { %1172 = vmatprep.subr.mxu1 %v1304_v2 }
 0x1e3   :  { %1173 = vmatpush3.msra.mxu1 %v1468_v28 }
 0x1e4   :  { %1174 = vmatprep.subr.mxu1 %v1304_v2 }
 0x1e5   :  { %1175 = vmatpush3.msra.mxu1 %v1482_v31 }
 0x1e6   :  { %1176 = vmatprep.subr.mxu1 %v1304_v2 }
 0x1e7   :  { %1177 = vmatpush3.msra.mxu1 %v1491_v33 }
 0x1e8   :  { %1216 = vmatprep.subr.mxu1 %v1304_v2 }
 0x288   :  { %v401_v61 = vpop.f32.mrf.mxu1 }
 0x289   :  { %v405_v62 = vadd.f32 %v401_v61, %v146_v60 }
 0x28a   :  { %v1110_v63 = vpop.f32.mrf.mxu1 }
 0x28b   :  { %1292 = vtanh.f32 %v405_v62 }
 0x298   :  { %v1293_v0 = vpop.eup %1292 }
 0x299   :  { %796 = vst [vmem:[%s1812_s4 + $0x10] sm:$0xff] %v1293_v0  ;;  %1144 = vmatmul.mubr.f32.vlgmr.msra.gmra.mxu0 %v1293_v0 }
 0x29a   :  { %1182 = vmatpush3.msra.mxu0 %v1341_v3  ;;  %1213 = vmatprep.mubr.msk.f32.mxu0 %vm1305_vm0, %v1304_v2 }
 0x29b   :  { %1183 = vmatprep.subr.mxu0 %v1304_v2 }
 0x29c   :  { %1184 = vmatpush3.msra.mxu0 %v1349_v4 }
 0x29d   :  { %1185 = vmatprep.subr.mxu0 %v1304_v2 }
 0x29e   :  { %1186 = vmatpush3.msra.mxu0 %v1358_v6 }
 0x29f   :  { %1187 = vmatprep.subr.mxu0 %v1304_v2 }
 0x2a0   :  { %1188 = vmatpush3.msra.mxu0 %v1368_v8 }
 0x2a1   :  { %1189 = vmatprep.subr.mxu0 %v1304_v2 }
 0x2a2   :  { %1190 = vmatpush3.msra.mxu0 %v1378_v10 }
 0x2a3   :  { %1191 = vmatprep.subr.mxu0 %v1304_v2 }
 0x2a4   :  { %1192 = vmatpush3.msra.mxu0 %v1388_v12 }
 0x2a5   :  { %1193 = vmatprep.subr.mxu0 %v1304_v2 }
 0x2a6   :  { %1194 = vmatpush3.msra.mxu0 %v1398_v14 }
 0x2a7   :  { %1195 = vmatprep.subr.mxu0 %v1304_v2 }
 0x2a8   :  { %1196 = vmatpush3.msra.mxu0 %v1408_v16 }
 0x2a9   :  { %1197 = vmatprep.subr.mxu0 %v1304_v2 }
 0x2aa   :  { %1198 = vmatpush3.msra.mxu0 %v1418_v18 }
 0x2ab   :  { %1199 = vmatprep.subr.mxu0 %v1304_v2 }
 0x2ac   :  { %1200 = vmatpush3.msra.mxu0 %v1428_v20 }
 0x2ad   :  { %1201 = vmatprep.subr.mxu0 %v1304_v2 }
 0x2ae   :  { %1202 = vmatpush3.msra.mxu0 %v1438_v22 }
 0x2af   :  { %1203 = vmatprep.subr.mxu0 %v1304_v2 }
 0x2b0   :  { %1204 = vmatpush3.msra.mxu0 %v1448_v24 }
 0x2b1   :  { %1205 = vmatprep.subr.mxu0 %v1304_v2 }
 0x2b2   :  { %1206 = vmatpush3.msra.mxu0 %v1458_v26 }
 0x2b3   :  { %1207 = vmatprep.subr.mxu0 %v1304_v2 }
 0x2b4   :  { %1208 = vmatpush3.msra.mxu0 %v1468_v28 }
 0x2b5   :  { %1209 = vmatprep.subr.mxu0 %v1304_v2 }
 0x2b6   :  { %1210 = vmatpush3.msra.mxu0 %v1482_v31 }
 0x2b7   :  { %1211 = vmatprep.subr.mxu0 %v1304_v2 }
 0x2b8   :  { %1212 = vmatpush3.msra.mxu0 %v1491_v33 }
 0x2b9   :  { %1251 = vmatprep.subr.mxu0 %v1304_v2 }
 0x359   :  { %v477_v5 = vpop.f32.mrf.mxu0 }
 0x35a   :  { %v481_v7 = vadd.f32 %v477_v5, %v151_v1 }
 0x35b   :  { %v1145_v9 = vpop.f32.mrf.mxu0 }
 0x35c   :  { %1294 = vtanh.f32 %v481_v7 }
 0x369   :  { %v1295_v11 = vpop.eup %1294 }
 0x36a   :  { %797 = vst [vmem:[%s1812_s4 + $0x18] sm:$0xff] %v1295_v11  ;;  %1179 = vmatmul.mubr.f32.vlgmr.msra.gmra.mxu1 %v1295_v11 }
 0x36b   :  { %1217 = vmatpush3.msra.mxu1 %v1341_v3  ;;  %1248 = vmatprep.mubr.msk.f32.mxu1 %vm1305_vm0, %v1304_v2 }
 0x36c   :  { %1218 = vmatprep.subr.mxu1 %v1304_v2 }
 0x36d   :  { %1219 = vmatpush3.msra.mxu1 %v1349_v4 }
 0x36e   :  { %1220 = vmatprep.subr.mxu1 %v1304_v2 }
 0x36f   :  { %1221 = vmatpush3.msra.mxu1 %v1358_v6 }
 0x370   :  { %1222 = vmatprep.subr.mxu1 %v1304_v2 }
 0x371   :  { %1223 = vmatpush3.msra.mxu1 %v1368_v8 }
 0x372   :  { %1224 = vmatprep.subr.mxu1 %v1304_v2 }
 0x373   :  { %1225 = vmatpush3.msra.mxu1 %v1378_v10 }
 0x374   :  { %1226 = vmatprep.subr.mxu1 %v1304_v2 }
 0x375   :  { %1227 = vmatpush3.msra.mxu1 %v1388_v12 }
 0x376   :  { %1228 = vmatprep.subr.mxu1 %v1304_v2 }
 0x377   :  { %1229 = vmatpush3.msra.mxu1 %v1398_v14 }
 0x378   :  { %1230 = vmatprep.subr.mxu1 %v1304_v2 }
 0x379   :  { %1231 = vmatpush3.msra.mxu1 %v1408_v16 }
 0x37a   :  { %1232 = vmatprep.subr.mxu1 %v1304_v2 }
 0x37b   :  { %1233 = vmatpush3.msra.mxu1 %v1418_v18 }
 0x37c   :  { %1234 = vmatprep.subr.mxu1 %v1304_v2 }
 0x37d   :  { %1235 = vmatpush3.msra.mxu1 %v1428_v20 }
 0x37e   :  { %1236 = vmatprep.subr.mxu1 %v1304_v2 }
 0x37f   :  { %1237 = vmatpush3.msra.mxu1 %v1438_v22 }
 0x380   :  { %1238 = vmatprep.subr.mxu1 %v1304_v2 }
 0x381   :  { %1239 = vmatpush3.msra.mxu1 %v1448_v24 }
 0x382   :  { %1240 = vmatprep.subr.mxu1 %v1304_v2 }
 0x383   :  { %1241 = vmatpush3.msra.mxu1 %v1458_v26 }
 0x384   :  { %1242 = vmatprep.subr.mxu1 %v1304_v2 }
 0x385   :  { %1243 = vmatpush3.msra.mxu1 %v1468_v28 }
 0x386   :  { %1244 = vmatprep.subr.mxu1 %v1304_v2 }
 0x387   :  { %1245 = vmatpush3.msra.mxu1 %v1482_v31 }
 0x388   :  { %1246 = vmatprep.subr.mxu1 %v1304_v2 }
 0x389   :  { %1247 = vmatpush3.msra.mxu1 %v1491_v33 }
 0x42a   :  { %v553_v15 = vpop.f32.mrf.mxu1 }
 0x42b   :  { %v557_v17 = vadd.f32 %v553_v15, %v156_v13 }
 0x42c   :  { %v1180_v19 = vpop.f32.mrf.mxu1 }
 0x42d   :  { %1296 = vtanh.f32 %v557_v17 }
 0x43a   :  { %v1297_v21 = vpop.eup %1296 }
 0x43b   :  { %798 = vst [vmem:[%s1812_s4 + $0x20] sm:$0xff] %v1297_v21  ;;  %1214 = vmatmul.mubr.f32.vlgmr.msra.gmra.mxu0 %v1297_v21 }
 0x43c   :  { %1252 = vmatpush3.msra.mxu0 %v1341_v3  ;;  %1283 = vmatprep.mubr.msk.f32.mxu0 %vm1305_vm0, %v1304_v2  ;;  %v161_v3 = vadd.f32 %v1633_v51, %v1591_v43 }
 0x43d   :  { %1253 = vmatprep.subr.mxu0 %v1304_v2 }
 0x43e   :  { %1254 = vmatpush3.msra.mxu0 %v1349_v4 }
 0x43f   :  { %1255 = vmatprep.subr.mxu0 %v1304_v2 }
 0x440   :  { %1256 = vmatpush3.msra.mxu0 %v1358_v6 }
 0x441   :  { %1257 = vmatprep.subr.mxu0 %v1304_v2 }
 0x442   :  { %1258 = vmatpush3.msra.mxu0 %v1368_v8 }
 0x443   :  { %1259 = vmatprep.subr.mxu0 %v1304_v2 }
 0x444   :  { %1260 = vmatpush3.msra.mxu0 %v1378_v10 }
 0x445   :  { %1261 = vmatprep.subr.mxu0 %v1304_v2 }
 0x446   :  { %1262 = vmatpush3.msra.mxu0 %v1388_v12  ;;  %v166_v12 = vadd.f32 %v1591_v43, %v1639_v54 }
 0x447   :  { %1263 = vmatprep.subr.mxu0 %v1304_v2 }
 0x448   :  { %1264 = vmatpush3.msra.mxu0 %v1398_v14 }
 0x449   :  { %1265 = vmatprep.subr.mxu0 %v1304_v2 }
 0x44a   :  { %1266 = vmatpush3.msra.mxu0 %v1408_v16 }
 0x44b   :  { %1267 = vmatprep.subr.mxu0 %v1304_v2 }
 0x44c   :  { %1268 = vmatpush3.msra.mxu0 %v1418_v18 }
 0x44d   :  { %1269 = vmatprep.subr.mxu0 %v1304_v2 }
 0x44e   :  { %1270 = vmatpush3.msra.mxu0 %v1428_v20  ;;  %v171_v20 = vadd.f32 %v1637_v53, %v1591_v43 }
 0x44f   :  { %1271 = vmatprep.subr.mxu0 %v1304_v2 }
 0x450   :  { %1272 = vmatpush3.msra.mxu0 %v1438_v22 }
 0x451   :  { %1273 = vmatprep.subr.mxu0 %v1304_v2 }
 0x452   :  { %1274 = vmatpush3.msra.mxu0 %v1448_v24 }
 0x453   :  { %1275 = vmatprep.subr.mxu0 %v1304_v2 }
 0x454   :  { %1276 = vmatpush3.msra.mxu0 %v1458_v26 }
 0x455   :  { %1277 = vmatprep.subr.mxu0 %v1304_v2 }
 0x456   :  { %1278 = vmatpush3.msra.mxu0 %v1468_v28 }
 0x457   :  { %1279 = vmatprep.subr.mxu0 %v1304_v2 }
 0x458   :  { %1280 = vmatpush3.msra.mxu0 %v1482_v31 }
 0x459   :  { %1281 = vmatprep.subr.mxu0 %v1304_v2 }
 0x45a   :  { %1282 = vmatpush3.msra.mxu0 %v1491_v33 }
 0x4fb   :  { %v629_v4 = vpop.f32.mrf.mxu0 }
 0x4fc   :  { %v633_v6 = vadd.f32 %v629_v4, %v161_v3 }
 0x4fd   :  { %v1215_v8 = vpop.f32.mrf.mxu0 }
 0x4fe   :  { %1298 = vtanh.f32 %v633_v6 }
 0x50b   :  { %v1299_v10 = vpop.eup %1298 }
 0x50c   :  { %799 = vst [vmem:[%s1812_s4 + $0x28] sm:$0xff] %v1299_v10  ;;  %1249 = vmatmul.mubr.f32.vlgmr.msra.gmra.mxu1 %v1299_v10 }
 0x5cc   :  { %v705_v14 = vpop.f32.mrf.mxu1 }
 0x5cd   :  { %v709_v2 = vadd.f32 %v705_v14, %v166_v12 }
 0x5ce   :  { %v1250_v16 = vpop.f32.mrf.mxu1 }
 0x5cf   :  { %1300 = vtanh.f32 %v709_v2 }
 0x5dc   :  { %v1301_v18 = vpop.eup %1300 }
 0x5dd   :  { %800 = vst [vmem:[%s1812_s4 + $0x30] sm:$0xff] %v1301_v18  ;;  %1284 = vmatmul.mubr.f32.vlgmr.msra.gmra.mxu0 %v1301_v18 }
 0x69d   :  { %v781_v22 = vpop.f32.mrf.mxu0 }
 0x69e   :  { %v785_v23 = vadd.f32 %v781_v22, %v171_v20 }
 0x69f   :  { %v1285_v24 = vpop.f32.mrf.mxu0 }
 0x6a0   :  { %1302 = vtanh.f32 %v785_v23 }
 0x6ad   :  { %v1303_v25 = vpop.eup %1302 }
 0x6ae   :  { %801 = vst [vmem:[%s1812_s4 + $0x38] sm:$0xff] %v1303_v25 }

// kernel: rnn_forward.3
= control target key start
LH: loop header
LB: loop body
LE: loop exit
PB: predicated region body
PF: predicated region fallthrough
CT: control target
= control target key end

     0   :  { %9 = vsyncpa [#allocation5], 0  ;;  %s1322_s15 = smov [#allocation4]   ;;  %s1747_s0 = inlined_call_operand.vmem [shape: f32[8,8,4], index: 0, kind: input, shape index: {}]   ;;  %s1748_s1 = inlined_call_operand.vmem [shape: f32[4,128], index: 1, kind: input, shape index: {}]   ;;  %s1749_s2 = inlined_call_operand.hbm [shape: f32[128,128], index: 2, kind: input, shape index: {}]   ;;  %s1750_s3 = inlined_call_operand.vmem [shape: f32[1,128], index: 3, kind: input, shape index: {}]   ;;  %s1751_s4 = inlined_call_operand.vmem [shape: f32[8,8,128], index: 4, kind: output, shape index: {}]  }
   0x1   :  { %s19_s16 = sshll.u32 %s1322_s15, 4  ;;  %s20_s16 = int_to_ptr.vmem [resolvable:$true] %s19_s16 }
   0x2   :  { %s1308_s17 = scalar_lea.vmem %s20_s16, 2048  ;;  %p1313_p1 = scmp.lt.s32.totalorder %s20_s16, %s20_s16 }
   0x3   :  { %p1309_p0 = scmp.ne.s32.totalorder %s20_s16, %s1308_s17  ;;  %p1314_p2 = scmp.lt.s32.totalorder %s1308_s17, %s1308_s17 }
   0x5   :  { %p1315_p3 = por %p1314_p2, %p1313_p1 }
   0x7   :  { %p1316_p4 = pnand %p1315_p3, %p1309_p0 }
   0x9   :  { %1319 = shalt.err (!%p1316_p4)
}
   0xa   :  { %s1323_s18 = smov 128   ;;  %s1324_s19 = smov 8  }
   0xb   :  { %25 = dma.hbm_to_vmem [thread:$0]  %s1749_s2, 2048, %s20_s16, [#allocation5], %s1323_s18, %s1323_s18, %s1324_s19  }
   0xc   :  { %1320 = dma.done.wait [#allocation5], 2048  }
   0xd   :  { %1321 = vsyncadd [#allocation5], 4294965248  ;;  %v1325_v0 = vmov 0.0   ;;  %vm1326_vm0 = vmmov 0   ;;  %v1358_v1 = vld [vmem:[#allocation4 + $0x78] sm:$0xff]  ;;  %v1360_v2 = vld [vmem:[#allocation4 + $0x70] sm:$0xff] }
   0xe   :  { %999 = vmatprep.subr.mxu1 %v1325_v0  ;;  %1031 = vmatprep.mubr.msk.f32.mxu1 %vm1326_vm0, %v1325_v0  ;;  %v1364_v3 = vld [vmem:[#allocation4 + $0x68] sm:$0xff]  ;;  %vm93_vm1 = vcmask 1043456   ;;  %v1368_v4 = vld [vmem:[#allocation4 + $0x60] sm:$0xff]  ;;  %vm68_vm2 = vcmask 31744   ;;  %v1381_v8 = vld [vmem:[#allocation4 + $0x58] sm:$0xff] }
   0xf   :  { %1000 = vmatpush3.msra.mxu1 %v1358_v1  ;;  %v36_v5 = vld [vmem:[%s1748_s1] sm:$0xf]  ;;  %v54_v7 = vld [vmem:[%s1747_s0 + $0x8] sm:$0xff]  ;;  %v1386_v9 = vld [vmem:[#allocation4 + $0x50] sm:$0xff] }
  0x10   :  { %1001 = vmatprep.subr.mxu1 %v1325_v0  ;;  %v53_v6 = vld [vmem:[%s1747_s0] sm:$0xff]  ;;  %985 = vmatprep.subr.msk.mxu0 %vm93_vm1, %v36_v5  ;;  %v1392_v10 = vld [vmem:[#allocation4 + $0x48] sm:$0xff]  ;;  %v1404_v12 = vld [vmem:[#allocation4 + $0x38] sm:$0xff] }
  0x11   :  { %1002 = vmatpush3.msra.mxu1 %v1360_v2  ;;  %986 = vmatpush3.msk.msra.mxu0 %vm93_vm1, %v36_v5  ;;  %v1398_v11 = vld [vmem:[#allocation4 + $0x40] sm:$0xff]  ;;  %v1410_v13 = vld [vmem:[#allocation4 + $0x30] sm:$0xff]  ;;  %v1416_v14 = vld [vmem:[#allocation4 + $0x28] sm:$0xff] }
  0x12   :  { %1003 = vmatprep.subr.mxu1 %v1325_v0  ;;  %987 = vmatprep.mubr.msk.f32.mxu0 %vm68_vm2, %v53_v6  ;;  %v1422_v15 = vld [vmem:[#allocation4 + $0x20] sm:$0xff]  ;;  %v1428_v16 = vld [vmem:[#allocation4 + $0x18] sm:$0xff]  ;;  %v1434_v17 = vld [vmem:[#allocation4 + $0x10] sm:$0xff] }
  0x13   :  { %1004 = vmatpush3.msra.mxu1 %v1364_v3  ;;  %988 = vmatmul.mubr.msk.f32.vlgmr.msra.gmra.mxu0 %vm68_vm2, %v54_v7  ;;  %v1440_v18 = vld [vmem:[#allocation4 + $0x8] sm:$0xff]  ;;  %v1446_v19 = vld [vmem:[#allocation4] sm:$0xff]  ;;  %v55_v20 = vld [vmem:[%s1747_s0 + $0x10] sm:$0xff] }
  0x14   :  { %1005 = vmatprep.subr.mxu1 %v1325_v0  ;;  %1034 = vmatprep.subr.mxu0 %v1325_v0  ;;  %v56_v21 = vld [vmem:[%s1747_s0 + $0x18] sm:$0xff]  ;;  %v57_v22 = vld [vmem:[%s1747_s0 + $0x20] sm:$0xff]  ;;  %v58_v23 = vld [vmem:[%s1747_s0 + $0x28] sm:$0xff] }
  0x15   :  { %1006 = vmatpush3.msra.mxu1 %v1368_v4  ;;  %1035 = vmatpush3.msra.mxu0 %v1358_v1  ;;  %v59_v24 = vld [vmem:[%s1747_s0 + $0x30] sm:$0xff]  ;;  %v60_v25 = vld [vmem:[%s1747_s0 + $0x38] sm:$0xff]  ;;  %v1530_v27 = vld [vmem:[%s1750_s3] ss:$0 sm:$0xff] }
  0x16   :  { %1007 = vmatprep.subr.mxu1 %v1325_v0  ;;  %1036 = vmatprep.subr.mxu0 %v1325_v0 }
  0x17   :  { %1008 = vmatpush3.msra.mxu1 %v1381_v8  ;;  %1037 = vmatpush3.msra.mxu0 %v1360_v2 }
  0x18   :  { %1009 = vmatprep.subr.mxu1 %v1325_v0  ;;  %1038 = vmatprep.subr.mxu0 %v1325_v0 }
  0x19   :  { %1010 = vmatpush3.msra.mxu1 %v1386_v9  ;;  %1039 = vmatpush3.msra.mxu0 %v1364_v3 }
  0x1a   :  { %1011 = vmatprep.subr.mxu1 %v1325_v0  ;;  %1040 = vmatprep.subr.mxu0 %v1325_v0 }
  0x1b   :  { %1012 = vmatpush3.msra.mxu1 %v1392_v10  ;;  %1041 = vmatpush3.msra.mxu0 %v1368_v4 }
  0x1c   :  { %1013 = vmatprep.subr.mxu1 %v1325_v0  ;;  %1042 = vmatprep.subr.mxu0 %v1325_v0 }
  0x1d   :  { %1014 = vmatpush3.msra.mxu1 %v1398_v11  ;;  %1043 = vmatpush3.msra.mxu0 %v1381_v8 }
  0x1e   :  { %1015 = vmatprep.subr.mxu1 %v1325_v0  ;;  %1044 = vmatprep.subr.mxu0 %v1325_v0 }
  0x1f   :  { %1016 = vmatpush3.msra.mxu1 %v1404_v12  ;;  %1045 = vmatpush3.msra.mxu0 %v1386_v9 }
  0x20   :  { %1017 = vmatprep.subr.mxu1 %v1325_v0  ;;  %1046 = vmatprep.subr.mxu0 %v1325_v0 }
  0x21   :  { %1018 = vmatpush3.msra.mxu1 %v1410_v13  ;;  %1047 = vmatpush3.msra.mxu0 %v1392_v10 }
  0x22   :  { %1019 = vmatprep.subr.mxu1 %v1325_v0  ;;  %1048 = vmatprep.subr.mxu0 %v1325_v0 }
  0x23   :  { %1020 = vmatpush3.msra.mxu1 %v1416_v14  ;;  %1049 = vmatpush3.msra.mxu0 %v1398_v11 }
  0x24   :  { %1021 = vmatprep.subr.mxu1 %v1325_v0  ;;  %1050 = vmatprep.subr.mxu0 %v1325_v0 }
  0x25   :  { %1022 = vmatpush3.msra.mxu1 %v1422_v15  ;;  %1051 = vmatpush3.msra.mxu0 %v1404_v12 }
  0x26   :  { %1023 = vmatprep.subr.mxu1 %v1325_v0  ;;  %1052 = vmatprep.subr.mxu0 %v1325_v0 }
  0x27   :  { %1024 = vmatpush3.msra.mxu1 %v1428_v16  ;;  %1053 = vmatpush3.msra.mxu0 %v1410_v13 }
  0x28   :  { %1025 = vmatprep.subr.mxu1 %v1325_v0  ;;  %1054 = vmatprep.subr.mxu0 %v1325_v0 }
  0x29   :  { %1026 = vmatpush3.msra.mxu1 %v1434_v17  ;;  %1055 = vmatpush3.msra.mxu0 %v1416_v14 }
  0x2a   :  { %1027 = vmatprep.subr.mxu1 %v1325_v0  ;;  %1056 = vmatprep.subr.mxu0 %v1325_v0 }
  0x2b   :  { %1028 = vmatpush3.msra.mxu1 %v1440_v18  ;;  %1057 = vmatpush3.msra.mxu0 %v1422_v15 }
  0x2c   :  { %1029 = vmatprep.subr.mxu1 %v1325_v0  ;;  %1058 = vmatprep.subr.mxu0 %v1325_v0 }
  0x2d   :  { %1030 = vmatpush3.msra.mxu1 %v1446_v19  ;;  %1059 = vmatpush3.msra.mxu0 %v1428_v16 }
  0x2e   :  { %1032 = vmatmul.mubr.f32.vlgmr.msra.gmra.mxu1 %v1325_v0  ;;  %1069 = vmatprep.subr.mxu1 %v1325_v0 }
  0x2f   :  { %1070 = vmatpush3.msra.mxu1 %v1358_v1  ;;  %1060 = vmatprep.subr.mxu0 %v1325_v0 }
  0x30   :  { %1071 = vmatprep.subr.mxu1 %v1325_v0  ;;  %1061 = vmatpush3.msra.mxu0 %v1434_v17 }
  0x31   :  { %1072 = vmatpush3.msra.mxu1 %v1360_v2  ;;  %1062 = vmatprep.subr.mxu0 %v1325_v0 }
  0x32   :  { %1073 = vmatprep.subr.mxu1 %v1325_v0  ;;  %1063 = vmatpush3.msra.mxu0 %v1440_v18 }
  0x33   :  { %1074 = vmatpush3.msra.mxu1 %v1364_v3  ;;  %1064 = vmatprep.subr.mxu0 %v1325_v0 }
  0x34   :  { %1075 = vmatprep.subr.mxu1 %v1325_v0  ;;  %1065 = vmatpush3.msra.mxu0 %v1446_v19 }
  0x35   :  { %1076 = vmatpush3.msra.mxu1 %v1368_v4  ;;  %1101 = vmatprep.mubr.msk.f32.mxu1 %vm1326_vm0, %v1325_v0 }
  0x36   :  { %1077 = vmatprep.subr.mxu1 %v1325_v0  ;;  %1104 = vmatprep.subr.mxu0 %v1325_v0 }
  0x37   :  { %1078 = vmatpush3.msra.mxu1 %v1381_v8  ;;  %990 = vmatprep.mubr.msk.f32.mxu0 %vm68_vm2, %v55_v20 }
  0x38   :  { %1079 = vmatprep.subr.mxu1 %v1325_v0  ;;  %991 = vmatmul.mubr.msk.f32.gmra.mxu0 %vm68_vm2, %v56_v21 }
  0x39   :  { %1080 = vmatpush3.msra.mxu1 %v1386_v9  ;;  %993 = vmatprep.mubr.msk.f32.mxu0 %vm68_vm2, %v57_v22 }
  0x3a   :  { %1081 = vmatprep.subr.mxu1 %v1325_v0 }
  0x3b   :  { %1082 = vmatpush3.msra.mxu1 %v1392_v10 }
  0x3c   :  { %1083 = vmatprep.subr.mxu1 %v1325_v0  ;;  %994 = vmatmul.mubr.msk.f32.gmra.mxu0 %vm68_vm2, %v58_v23 }
  0x3d   :  { %1084 = vmatpush3.msra.mxu1 %v1398_v11  ;;  %996 = vmatprep.mubr.msk.f32.mxu0 %vm68_vm2, %v59_v24 }
  0x3e   :  { %1085 = vmatprep.subr.mxu1 %v1325_v0 }
  0x3f   :  { %1086 = vmatpush3.msra.mxu1 %v1404_v12 }
  0x40   :  { %1087 = vmatprep.subr.mxu1 %v1325_v0  ;;  %997 = vmatmul.mubr.msk.f32.gmra.mxu0 %vm68_vm2, %v60_v25 }
  0x41   :  { %1088 = vmatpush3.msra.mxu1 %v1410_v13  ;;  %1066 = vmatprep.mubr.msk.f32.mxu0 %vm1326_vm0, %v1325_v0 }
  0x42   :  { %1089 = vmatprep.subr.mxu1 %v1325_v0 }
  0x43   :  { %1090 = vmatpush3.msra.mxu1 %v1416_v14 }
  0x44   :  { %1091 = vmatprep.subr.mxu1 %v1325_v0 }
  0x45   :  { %1092 = vmatpush3.msra.mxu1 %v1422_v15 }
  0x46   :  { %1093 = vmatprep.subr.mxu1 %v1325_v0 }
  0x47   :  { %1094 = vmatpush3.msra.mxu1 %v1428_v16 }
  0x48   :  { %1095 = vmatprep.subr.mxu1 %v1325_v0 }
  0x49   :  { %1096 = vmatpush3.msra.mxu1 %v1434_v17 }
  0x4a   :  { %1097 = vmatprep.subr.mxu1 %v1325_v0 }
  0x4b   :  { %1098 = vmatpush3.msra.mxu1 %v1440_v18 }
  0x4c   :  { %1099 = vmatprep.subr.mxu1 %v1325_v0 }
  0x4d   :  { %1100 = vmatpush3.msra.mxu1 %v1446_v19 }
  0x4e   :  { %1139 = vmatprep.subr.mxu1 %v1325_v0 }
  0xd3   :  { %v989_v26 = vpop.f32.mrf.mxu0 }
  0xd4   :  { %v169_v40 = vadd.f32 %v989_v26, %v1530_v27 }
  0xd5   :  { %v163_v28 = vpop.f32.mrf.mxu0 }
  0xd6   :  { %v164_v29 = vadd.f32 %v1530_v27, %v163_v28 }
  0xee   :  { %v278_v30 = vpop.f32.mrf.mxu1 }
  0xef   :  { %v282_v31 = vadd.f32 %v278_v30, %v164_v29 }
  0xf0   :  { %v1033_v32 = vpop.f32.mrf.mxu1 }
  0xf1   :  { %1284 = vtanh.f32 %v282_v31 }
  0xf8   :  { %v1570_v34 = vpop.f32.mrf.mxu0 }
  0xf9   :  { %v179_v50 = vadd.f32 %v1570_v34, %v1530_v27 }
  0xfa   :  { %v173_v35 = vpop.f32.mrf.mxu0 }
  0xfb   :  { %v174_v45 = vadd.f32 %v1530_v27, %v173_v35 }
  0xfc   :  { %v1572_v36 = vpop.f32.mrf.mxu0 }
  0xfd   :  { %v189_v60 = vadd.f32 %v1572_v36, %v1530_v27 }
  0xfe   :  { %v1285_v33 = vpop.eup %1284  ;;  %v1574_v37 = vpop.f32.mrf.mxu0 }
  0xff   :  { %284 = vst [vmem:[%s1751_s4] sm:$0xff] %v1285_v33  ;;  %1067 = vmatmul.mubr.f32.vlgmr.msra.gmra.mxu0 %v1285_v33  ;;  %v184_v55 = vadd.f32 %v1530_v27, %v1574_v37 }
 0x100   :  { %1105 = vmatpush3.msra.mxu0 %v1358_v1  ;;  %1136 = vmatprep.mubr.msk.f32.mxu0 %vm1326_vm0, %v1325_v0  ;;  %v1576_v38 = vpop.f32.mrf.mxu0 }
 0x101   :  { %1106 = vmatprep.subr.mxu0 %v1325_v0  ;;  %v199_v6 = vadd.f32 %v1576_v38, %v1530_v27 }
 0x102   :  { %1107 = vmatpush3.msra.mxu0 %v1360_v2  ;;  %v1578_v39 = vpop.f32.mrf.mxu0 }
 0x103   :  { %1108 = vmatprep.subr.mxu0 %v1325_v0 }
 0x104   :  { %1109 = vmatpush3.msra.mxu0 %v1364_v3 }
 0x105   :  { %1110 = vmatprep.subr.mxu0 %v1325_v0 }
 0x106   :  { %1111 = vmatpush3.msra.mxu0 %v1368_v4 }
 0x107   :  { %1112 = vmatprep.subr.mxu0 %v1325_v0 }
 0x108   :  { %1113 = vmatpush3.msra.mxu0 %v1381_v8 }
 0x109   :  { %1114 = vmatprep.subr.mxu0 %v1325_v0 }
 0x10a   :  { %1115 = vmatpush3.msra.mxu0 %v1386_v9 }
 0x10b   :  { %1116 = vmatprep.subr.mxu0 %v1325_v0 }
 0x10c   :  { %1117 = vmatpush3.msra.mxu0 %v1392_v10 }
 0x10d   :  { %1118 = vmatprep.subr.mxu0 %v1325_v0 }
 0x10e   :  { %1119 = vmatpush3.msra.mxu0 %v1398_v11 }
 0x10f   :  { %1120 = vmatprep.subr.mxu0 %v1325_v0 }
 0x110   :  { %1121 = vmatpush3.msra.mxu0 %v1404_v12 }
 0x111   :  { %1122 = vmatprep.subr.mxu0 %v1325_v0 }
 0x112   :  { %1123 = vmatpush3.msra.mxu0 %v1410_v13 }
 0x113   :  { %1124 = vmatprep.subr.mxu0 %v1325_v0 }
 0x114   :  { %1125 = vmatpush3.msra.mxu0 %v1416_v14 }
 0x115   :  { %1126 = vmatprep.subr.mxu0 %v1325_v0 }
 0x116   :  { %1127 = vmatpush3.msra.mxu0 %v1422_v15 }
 0x117   :  { %1128 = vmatprep.subr.mxu0 %v1325_v0 }
 0x118   :  { %1129 = vmatpush3.msra.mxu0 %v1428_v16 }
 0x119   :  { %1130 = vmatprep.subr.mxu0 %v1325_v0 }
 0x11a   :  { %1131 = vmatpush3.msra.mxu0 %v1434_v17 }
 0x11b   :  { %1132 = vmatprep.subr.mxu0 %v1325_v0 }
 0x11c   :  { %1133 = vmatpush3.msra.mxu0 %v1440_v18 }
 0x11d   :  { %1134 = vmatprep.subr.mxu0 %v1325_v0 }
 0x11e   :  { %1135 = vmatpush3.msra.mxu0 %v1446_v19 }
 0x11f   :  { %1174 = vmatprep.subr.mxu0 %v1325_v0 }
 0x1bf   :  { %v353_v41 = vpop.f32.mrf.mxu0 }
 0x1c0   :  { %v357_v42 = vadd.f32 %v353_v41, %v169_v40 }
 0x1c1   :  { %v1068_v43 = vpop.f32.mrf.mxu0 }
 0x1c2   :  { %1286 = vtanh.f32 %v357_v42 }
 0x1cf   :  { %v1287_v44 = vpop.eup %1286 }
 0x1d0   :  { %833 = vst [vmem:[%s1751_s4 + $0x8] sm:$0xff] %v1287_v44  ;;  %1102 = vmatmul.mubr.f32.vlgmr.msra.gmra.mxu1 %v1287_v44 }
 0x1d1   :  { %1140 = vmatpush3.msra.mxu1 %v1358_v1  ;;  %1171 = vmatprep.mubr.msk.f32.mxu1 %vm1326_vm0, %v1325_v0 }
 0x1d2   :  { %1141 = vmatprep.subr.mxu1 %v1325_v0 }
 0x1d3   :  { %1142 = vmatpush3.msra.mxu1 %v1360_v2 }
 0x1d4   :  { %1143 = vmatprep.subr.mxu1 %v1325_v0 }
 0x1d5   :  { %1144 = vmatpush3.msra.mxu1 %v1364_v3 }
 0x1d6   :  { %1145 = vmatprep.subr.mxu1 %v1325_v0 }
 0x1d7   :  { %1146 = vmatpush3.msra.mxu1 %v1368_v4 }
 0x1d8   :  { %1147 = vmatprep.subr.mxu1 %v1325_v0 }
 0x1d9   :  { %1148 = vmatpush3.msra.mxu1 %v1381_v8 }
 0x1da   :  { %1149 = vmatprep.subr.mxu1 %v1325_v0 }
 0x1db   :  { %1150 = vmatpush3.msra.mxu1 %v1386_v9 }
 0x1dc   :  { %1151 = vmatprep.subr.mxu1 %v1325_v0 }
 0x1dd   :  { %1152 = vmatpush3.msra.mxu1 %v1392_v10 }
 0x1de   :  { %1153 = vmatprep.subr.mxu1 %v1325_v0 }
 0x1df   :  { %1154 = vmatpush3.msra.mxu1 %v1398_v11 }
 0x1e0   :  { %1155 = vmatprep.subr.mxu1 %v1325_v0 }
 0x1e1   :  { %1156 = vmatpush3.msra.mxu1 %v1404_v12 }
 0x1e2   :  { %1157 = vmatprep.subr.mxu1 %v1325_v0 }
 0x1e3   :  { %1158 = vmatpush3.msra.mxu1 %v1410_v13 }
 0x1e4   :  { %1159 = vmatprep.subr.mxu1 %v1325_v0 }
 0x1e5   :  { %1160 = vmatpush3.msra.mxu1 %v1416_v14 }
 0x1e6   :  { %1161 = vmatprep.subr.mxu1 %v1325_v0 }
 0x1e7   :  { %1162 = vmatpush3.msra.mxu1 %v1422_v15 }
 0x1e8   :  { %1163 = vmatprep.subr.mxu1 %v1325_v0 }
 0x1e9   :  { %1164 = vmatpush3.msra.mxu1 %v1428_v16 }
 0x1ea   :  { %1165 = vmatprep.subr.mxu1 %v1325_v0 }
 0x1eb   :  { %1166 = vmatpush3.msra.mxu1 %v1434_v17 }
 0x1ec   :  { %1167 = vmatprep.subr.mxu1 %v1325_v0 }
 0x1ed   :  { %1168 = vmatpush3.msra.mxu1 %v1440_v18 }
 0x1ee   :  { %1169 = vmatprep.subr.mxu1 %v1325_v0 }
 0x1ef   :  { %1170 = vmatpush3.msra.mxu1 %v1446_v19 }
 0x1f0   :  { %1209 = vmatprep.subr.mxu1 %v1325_v0 }
 0x290   :  { %v429_v46 = vpop.f32.mrf.mxu1 }
 0x291   :  { %v433_v47 = vadd.f32 %v429_v46, %v174_v45 }
 0x292   :  { %v1103_v48 = vpop.f32.mrf.mxu1 }
 0x293   :  { %1288 = vtanh.f32 %v433_v47 }
 0x2a0   :  { %v1289_v49 = vpop.eup %1288 }
 0x2a1   :  { %834 = vst [vmem:[%s1751_s4 + $0x10] sm:$0xff] %v1289_v49  ;;  %1137 = vmatmul.mubr.f32.vlgmr.msra.gmra.mxu0 %v1289_v49 }
 0x2a2   :  { %1175 = vmatpush3.msra.mxu0 %v1358_v1  ;;  %1206 = vmatprep.mubr.msk.f32.mxu0 %vm1326_vm0, %v1325_v0 }
 0x2a3   :  { %1176 = vmatprep.subr.mxu0 %v1325_v0 }
 0x2a4   :  { %1177 = vmatpush3.msra.mxu0 %v1360_v2 }
 0x2a5   :  { %1178 = vmatprep.subr.mxu0 %v1325_v0 }
 0x2a6   :  { %1179 = vmatpush3.msra.mxu0 %v1364_v3 }
 0x2a7   :  { %1180 = vmatprep.subr.mxu0 %v1325_v0 }
 0x2a8   :  { %1181 = vmatpush3.msra.mxu0 %v1368_v4 }
 0x2a9   :  { %1182 = vmatprep.subr.mxu0 %v1325_v0 }
 0x2aa   :  { %1183 = vmatpush3.msra.mxu0 %v1381_v8 }
 0x2ab   :  { %1184 = vmatprep.subr.mxu0 %v1325_v0 }
 0x2ac   :  { %1185 = vmatpush3.msra.mxu0 %v1386_v9 }
 0x2ad   :  { %1186 = vmatprep.subr.mxu0 %v1325_v0 }
 0x2ae   :  { %1187 = vmatpush3.msra.mxu0 %v1392_v10 }
 0x2af   :  { %1188 = vmatprep.subr.mxu0 %v1325_v0 }
 0x2b0   :  { %1189 = vmatpush3.msra.mxu0 %v1398_v11 }
 0x2b1   :  { %1190 = vmatprep.subr.mxu0 %v1325_v0 }
 0x2b2   :  { %1191 = vmatpush3.msra.mxu0 %v1404_v12 }
 0x2b3   :  { %1192 = vmatprep.subr.mxu0 %v1325_v0 }
 0x2b4   :  { %1193 = vmatpush3.msra.mxu0 %v1410_v13 }
 0x2b5   :  { %1194 = vmatprep.subr.mxu0 %v1325_v0 }
 0x2b6   :  { %1195 = vmatpush3.msra.mxu0 %v1416_v14 }
 0x2b7   :  { %1196 = vmatprep.subr.mxu0 %v1325_v0 }
 0x2b8   :  { %1197 = vmatpush3.msra.mxu0 %v1422_v15 }
 0x2b9   :  { %1198 = vmatprep.subr.mxu0 %v1325_v0 }
 0x2ba   :  { %1199 = vmatpush3.msra.mxu0 %v1428_v16 }
 0x2bb   :  { %1200 = vmatprep.subr.mxu0 %v1325_v0 }
 0x2bc   :  { %1201 = vmatpush3.msra.mxu0 %v1434_v17 }
 0x2bd   :  { %1202 = vmatprep.subr.mxu0 %v1325_v0 }
 0x2be   :  { %1203 = vmatpush3.msra.mxu0 %v1440_v18 }
 0x2bf   :  { %1204 = vmatprep.subr.mxu0 %v1325_v0 }
 0x2c0   :  { %1205 = vmatpush3.msra.mxu0 %v1446_v19 }
 0x2c1   :  { %1244 = vmatprep.subr.mxu0 %v1325_v0 }
 0x361   :  { %v505_v51 = vpop.f32.mrf.mxu0 }
 0x362   :  { %v509_v52 = vadd.f32 %v505_v51, %v179_v50 }
 0x363   :  { %v1138_v53 = vpop.f32.mrf.mxu0 }
 0x364   :  { %1290 = vtanh.f32 %v509_v52 }
 0x371   :  { %v1291_v54 = vpop.eup %1290 }
 0x372   :  { %835 = vst [vmem:[%s1751_s4 + $0x18] sm:$0xff] %v1291_v54  ;;  %1172 = vmatmul.mubr.f32.vlgmr.msra.gmra.mxu1 %v1291_v54 }
 0x373   :  { %1210 = vmatpush3.msra.mxu1 %v1358_v1  ;;  %1241 = vmatprep.mubr.msk.f32.mxu1 %vm1326_vm0, %v1325_v0 }
 0x374   :  { %1211 = vmatprep.subr.mxu1 %v1325_v0 }
 0x375   :  { %1212 = vmatpush3.msra.mxu1 %v1360_v2 }
 0x376   :  { %1213 = vmatprep.subr.mxu1 %v1325_v0 }
 0x377   :  { %1214 = vmatpush3.msra.mxu1 %v1364_v3 }
 0x378   :  { %1215 = vmatprep.subr.mxu1 %v1325_v0 }
 0x379   :  { %1216 = vmatpush3.msra.mxu1 %v1368_v4 }
 0x37a   :  { %1217 = vmatprep.subr.mxu1 %v1325_v0 }
 0x37b   :  { %1218 = vmatpush3.msra.mxu1 %v1381_v8 }
 0x37c   :  { %1219 = vmatprep.subr.mxu1 %v1325_v0 }
 0x37d   :  { %1220 = vmatpush3.msra.mxu1 %v1386_v9 }
 0x37e   :  { %1221 = vmatprep.subr.mxu1 %v1325_v0 }
 0x37f   :  { %1222 = vmatpush3.msra.mxu1 %v1392_v10 }
 0x380   :  { %1223 = vmatprep.subr.mxu1 %v1325_v0 }
 0x381   :  { %1224 = vmatpush3.msra.mxu1 %v1398_v11 }
 0x382   :  { %1225 = vmatprep.subr.mxu1 %v1325_v0 }
 0x383   :  { %1226 = vmatpush3.msra.mxu1 %v1404_v12 }
 0x384   :  { %1227 = vmatprep.subr.mxu1 %v1325_v0 }
 0x385   :  { %1228 = vmatpush3.msra.mxu1 %v1410_v13 }
 0x386   :  { %1229 = vmatprep.subr.mxu1 %v1325_v0 }
 0x387   :  { %1230 = vmatpush3.msra.mxu1 %v1416_v14 }
 0x388   :  { %1231 = vmatprep.subr.mxu1 %v1325_v0 }
 0x389   :  { %1232 = vmatpush3.msra.mxu1 %v1422_v15 }
 0x38a   :  { %1233 = vmatprep.subr.mxu1 %v1325_v0 }
 0x38b   :  { %1234 = vmatpush3.msra.mxu1 %v1428_v16 }
 0x38c   :  { %1235 = vmatprep.subr.mxu1 %v1325_v0 }
 0x38d   :  { %1236 = vmatpush3.msra.mxu1 %v1434_v17 }
 0x38e   :  { %1237 = vmatprep.subr.mxu1 %v1325_v0 }
 0x38f   :  { %1238 = vmatpush3.msra.mxu1 %v1440_v18 }
 0x390   :  { %1239 = vmatprep.subr.mxu1 %v1325_v0 }
 0x391   :  { %1240 = vmatpush3.msra.mxu1 %v1446_v19 }
 0x432   :  { %v581_v56 = vpop.f32.mrf.mxu1 }
 0x433   :  { %v585_v57 = vadd.f32 %v581_v56, %v184_v55 }
 0x434   :  { %v1173_v58 = vpop.f32.mrf.mxu1 }
 0x435   :  { %1292 = vtanh.f32 %v585_v57 }
 0x442   :  { %v1293_v59 = vpop.eup %1292 }
 0x443   :  { %836 = vst [vmem:[%s1751_s4 + $0x20] sm:$0xff] %v1293_v59  ;;  %1207 = vmatmul.mubr.f32.vlgmr.msra.gmra.mxu0 %v1293_v59 }
 0x444   :  { %1245 = vmatpush3.msra.mxu0 %v1358_v1  ;;  %1276 = vmatprep.mubr.msk.f32.mxu0 %vm1326_vm0, %v1325_v0 }
 0x445   :  { %1246 = vmatprep.subr.mxu0 %v1325_v0 }
 0x446   :  { %1247 = vmatpush3.msra.mxu0 %v1360_v2  ;;  %v194_v2 = vadd.f32 %v1530_v27, %v1578_v39 }
 0x447   :  { %1248 = vmatprep.subr.mxu0 %v1325_v0 }
 0x448   :  { %1249 = vmatpush3.msra.mxu0 %v1364_v3 }
 0x449   :  { %1250 = vmatprep.subr.mxu0 %v1325_v0 }
 0x44a   :  { %1251 = vmatpush3.msra.mxu0 %v1368_v4 }
 0x44b   :  { %1252 = vmatprep.subr.mxu0 %v1325_v0 }
 0x44c   :  { %1253 = vmatpush3.msra.mxu0 %v1381_v8 }
 0x44d   :  { %1254 = vmatprep.subr.mxu0 %v1325_v0 }
 0x44e   :  { %1255 = vmatpush3.msra.mxu0 %v1386_v9 }
 0x44f   :  { %1256 = vmatprep.subr.mxu0 %v1325_v0 }
 0x450   :  { %1257 = vmatpush3.msra.mxu0 %v1392_v10 }
 0x451   :  { %1258 = vmatprep.subr.mxu0 %v1325_v0 }
 0x452   :  { %1259 = vmatpush3.msra.mxu0 %v1398_v11 }
 0x453   :  { %1260 = vmatprep.subr.mxu0 %v1325_v0 }
 0x454   :  { %1261 = vmatpush3.msra.mxu0 %v1404_v12 }
 0x455   :  { %1262 = vmatprep.subr.mxu0 %v1325_v0 }
 0x456   :  { %1263 = vmatpush3.msra.mxu0 %v1410_v13 }
 0x457   :  { %1264 = vmatprep.subr.mxu0 %v1325_v0 }
 0x458   :  { %1265 = vmatpush3.msra.mxu0 %v1416_v14 }
 0x459   :  { %1266 = vmatprep.subr.mxu0 %v1325_v0 }
 0x45a   :  { %1267 = vmatpush3.msra.mxu0 %v1422_v15 }
 0x45b   :  { %1268 = vmatprep.subr.mxu0 %v1325_v0 }
 0x45c   :  { %1269 = vmatpush3.msra.mxu0 %v1428_v16 }
 0x45d   :  { %1270 = vmatprep.subr.mxu0 %v1325_v0 }
 0x45e   :  { %1271 = vmatpush3.msra.mxu0 %v1434_v17 }
 0x45f   :  { %1272 = vmatprep.subr.mxu0 %v1325_v0 }
 0x460   :  { %1273 = vmatpush3.msra.mxu0 %v1440_v18 }
 0x461   :  { %1274 = vmatprep.subr.mxu0 %v1325_v0 }
 0x462   :  { %1275 = vmatpush3.msra.mxu0 %v1446_v19 }
 0x503   :  { %v657_v61 = vpop.f32.mrf.mxu0 }
 0x504   :  { %v661_v62 = vadd.f32 %v657_v61, %v189_v60 }
 0x505   :  { %v1208_v63 = vpop.f32.mrf.mxu0 }
 0x506   :  { %1294 = vtanh.f32 %v661_v62 }
 0x513   :  { %v1295_v1 = vpop.eup %1294 }
 0x514   :  { %837 = vst [vmem:[%s1751_s4 + $0x28] sm:$0xff] %v1295_v1  ;;  %1242 = vmatmul.mubr.f32.vlgmr.msra.gmra.mxu1 %v1295_v1 }
 0x5d4   :  { %v733_v3 = vpop.f32.mrf.mxu1 }
 0x5d5   :  { %v737_v0 = vadd.f32 %v733_v3, %v194_v2 }
 0x5d6   :  { %v1243_v4 = vpop.f32.mrf.mxu1 }
 0x5d7   :  { %1296 = vtanh.f32 %v737_v0 }
 0x5e4   :  { %v1297_v5 = vpop.eup %1296 }
 0x5e5   :  { %838 = vst [vmem:[%s1751_s4 + $0x30] sm:$0xff] %v1297_v5  ;;  %1277 = vmatmul.mubr.f32.vlgmr.msra.gmra.mxu0 %v1297_v5 }
 0x6a5   :  { %v809_v7 = vpop.f32.mrf.mxu0 }
 0x6a6   :  { %v813_v8 = vadd.f32 %v809_v7, %v199_v6 }
 0x6a7   :  { %v1278_v9 = vpop.f32.mrf.mxu0 }
 0x6a8   :  { %1298 = vtanh.f32 %v813_v8 }
 0x6b5   :  { %v1299_v10 = vpop.eup %1298 }
 0x6b6   :  { %839 = vst [vmem:[%s1751_s4 + $0x38] sm:$0xff] %v1299_v10 }
 0x6b7   :  { %822 = vsyncpa [#allocation5], 1 }

</bundles_post_ra>
